<compile_context>
chip_gen: v7x
topology: tpu7x:2x2x1
jax: 0.10.0
libtpu: 0.0.40
codegen_flags: <defaults>
</compile_context>

<pallas_src>
import functools

import jax
import jax.numpy as jnp
from jax import lax
from jax.experimental import pallas as pl
from jax.experimental.pallas import tpu as pltpu


def _leaky(v):
    # nn.LeakyReLU() default negative_slope = 0.01
    return jnp.where(v > 0, v, 0.01 * v)


def fmrb_kernel(mask_ref, x_ref, w1_ref, b1_ref, wc_ref, b2_ref, w3_ref,
                b3_ref, o_ref, ext_ref, *, wp):
    """Channel-major FMRB on one image.

    Shapes (J = (H+4)*(W+4) flat padded spatial, mapped to TPU lanes):
      x_ref    : (1, C, J)      zero-padded input image, flattened
      mask_ref : (1, J)         1.0 on the valid interior, 0.0 on the pad ring
      w1_ref   : (2C, C)        Conv1 (1x1)            b1_ref : (2C, 1)
      wc_ref   : (5, 5, 2C, 2C) fused Conv2_1+Conv2_2  b2_ref : (2C, 1)
      w3_ref   : (C, 2C)        Conv3 (1x1)            b3_ref : (C, 1)
      o_ref    : (1, C, J)      out5 on the padded-flat grid (wrapper crops)
      ext_ref  : (2C, J + 2*OFF) scratch line with an OFF-lane halo per side
    """
    c2, ext_len = ext_ref.shape
    j = x_ref.shape[-1]
    off = (ext_len - j) // 2          # lane-aligned halo (multiple of 128)

    # Halo lanes only ever feed output positions that the wrapper crops away,
    # so their contents are correctness-irrelevant; zero them once for
    # tidiness (on megacore shards that never see step 0 they stay stale,
    # which is still harmless for the same reason).
    @pl.when(pl.program_id(0) == 0)
    def _init():
        ext_ref[...] = jnp.zeros_like(ext_ref)

    xp = x_ref[0]                                                # (C, J)

    # ---- Conv1 (1x1, C -> 2C) + LeakyReLU --------------------------------
    # The mask zeroes the pad ring so it behaves exactly like Conv2's zero
    # padding of out1.
    out1 = _leaky(jnp.dot(w1_ref[...], xp,
                          preferred_element_type=jnp.float32)
                  + b1_ref[...]) * mask_ref[...]                 # (2C, J)

    # Interior store is lane-aligned (off % 128 == 0); halo stays untouched.
    ext_ref[:, off:off + j] = out1

    # ---- fused Conv2 (25 taps of a 5x5, pad 2) ---------------------------
    # Output flat index i needs input flat index i + (dy-2)*Wp + (dx-2); every
    # tap is a lane-shifted slice of the same scratch line feeding one
    # (2C,2C) x (2C,J) matmul into a flat f32 accumulator.
    acc = jnp.zeros((c2, j), jnp.float32)
    for dy in range(5):
        for dx in range(5):
            start = off + (dy - 2) * wp + (dx - 2)
            win = ext_ref[:, start:start + j]                    # (2C, J)
            acc = acc + jnp.dot(wc_ref[dy, dx], win.astype(wc_ref.dtype),
                                preferred_element_type=jnp.float32)

    out2 = _leaky(acc + b2_ref[...])          # bias + LReLU applied once
    out3 = out1 + out2

    # ---- Conv3 (1x1, 2C -> C) + LeakyReLU, residual add ------------------
    out4 = _leaky(jnp.dot(w3_ref[...], out3,
                          preferred_element_type=jnp.float32)
                  + b3_ref[...])
    o_ref[0] = (xp + out4).astype(o_ref.dtype)


def fmrb_forward(x_nchw, params, *, matmul_dtype=jnp.float32):
    """x_nchw: (N, C, H, W) float32 -> (N, C, H, W) float32.

    matmul_dtype: dtype of the fused 5x5 weights/activations fed to the MXU
    (use jnp.bfloat16 on v6e/v7x once channel counts are large enough for the
    conv to be MXU-bound; accumulation stays f32 either way).
    """
    N, C, H, W = x_nchw.shape
    C2 = 2 * C
    Hp, Wp = H + 4, W + 4
    J = Hp * Wp
    # Lane-aligned halo on each side of the flat scratch line, >= 2*Wp + 2.
    OFF = ((2 * Wp + 2 + 127) // 128) * 128

    # --- fold Conv2_1 (3x3, pad 1) into Conv2_2 (5x5, pad 2): exact algebra.
    wc = params["w22"].astype(jnp.float32)
    wc = wc.at[:, :, 1:4, 1:4].add(params["w21"])                # (Co,Ci,5,5)
    wc = jnp.transpose(wc, (2, 3, 0, 1)).astype(matmul_dtype)    # (5,5,Co,Ci)
    b2 = (params["b21"] + params["b22"]).reshape(C2, 1)

    w1 = params["w1"].reshape(C2, C)
    b1 = params["b1"].reshape(C2, 1)
    w3 = params["w3"].reshape(C, C2)
    b3 = params["b3"].reshape(C, 1)

    # --- zero-pad by 2 and flatten spatial onto the lane axis; NCHW needs no
    #     transpose in this layout.
    xp = jnp.pad(x_nchw, ((0, 0), (0, 0), (2, 2), (2, 2))).reshape(N, C, J)
    mask = jnp.zeros((Hp, Wp), x_nchw.dtype)
    mask = mask.at[2:2 + H, 2:2 + W].set(1.0).reshape(1, J)

    kernel = functools.partial(fmrb_kernel, wp=Wp)

    out_flat = pl.pallas_call(
        kernel,
        out_shape=jax.ShapeDtypeStruct((N, C, J), x_nchw.dtype),
        grid_spec=pltpu.PrefetchScalarGridSpec(
            num_scalar_prefetch=0,
            grid=(N,),
            in_specs=[
                pl.BlockSpec((1, J), lambda n: (0, 0)),                # mask
                pl.BlockSpec((1, C, J), lambda n: (n, 0, 0)),          # x pad
                pl.BlockSpec((C2, C), lambda n: (0, 0)),               # w1
                pl.BlockSpec((C2, 1), lambda n: (0, 0)),               # b1
                pl.BlockSpec((5, 5, C2, C2), lambda n: (0, 0, 0, 0)),  # wcomb
                pl.BlockSpec((C2, 1), lambda n: (0, 0)),               # bcomb
                pl.BlockSpec((C, C2), lambda n: (0, 0)),               # w3
                pl.BlockSpec((C, 1), lambda n: (0, 0)),                # b3
            ],
            out_specs=pl.BlockSpec((1, C, J), lambda n: (n, 0, 0)),
            scratch_shapes=[pltpu.VMEM((C2, J + 2 * OFF), jnp.float32)],
        ),
        compiler_params=pltpu.CompilerParams(
            dimension_semantics=("parallel",)),
    )(mask, xp, w1, b1, wc, b2, w3, b3)

    # Crop the padding ring and restore (N, C, H, W) — a cheap XLA slice.
    return out_flat.reshape(N, C, Hp, Wp)[:, :, 2:2 + H, 2:2 + W]


def fmrb_reference(x_nchw, params):
    """Pure-JAX reference (lax.conv, unfused weights) for validation."""
    C = x_nchw.shape[1]
    C2 = 2 * C

    def conv(inp, w, b, pad):
        y = lax.conv_general_dilated(
            inp, w, window_strides=(1, 1),
            padding=[(pad, pad), (pad, pad)],
            dimension_numbers=("NCHW", "OIHW", "NCHW"),
            precision=lax.Precision.HIGHEST)
        return y + b[None, :, None, None]

    lrelu = lambda v: jnp.where(v > 0, v, 0.01 * v)
    w1 = params["w1"].reshape(C2, C, 1, 1)
    w3 = params["w3"].reshape(C, C2, 1, 1)

    out1 = lrelu(conv(x_nchw, w1, params["b1"], 0))
    out2 = lrelu(conv(out1, params["w21"], params["b21"], 1)
                 + conv(out1, params["w22"], params["b22"], 2))
    out3 = out1 + out2
    out4 = lrelu(conv(out3, w3, params["b3"], 0))
    return x_nchw + out4


def make_params(key, C):
    """PyTorch-convention (Cout, Cin, kh, kw) weights."""
    C2 = 2 * C
    ks = jax.random.split(key, 8)
    s = 0.1
    return {
        "w1":  s * jax.random.normal(ks[0], (C2, C), jnp.float32),
        "b1":  s * jax.random.normal(ks[1], (C2,), jnp.float32),
        "w21": s * jax.random.normal(ks[2], (C2, C2, 3, 3), jnp.float32),
        "b21": s * jax.random.normal(ks[3], (C2,), jnp.float32),
        "w22": s * jax.random.normal(ks[4], (C2, C2, 5, 5), jnp.float32),
        "b22": s * jax.random.normal(ks[5], (C2,), jnp.float32),
        "w3":  s * jax.random.normal(ks[6], (C, C2), jnp.float32),
        "b3":  s * jax.random.normal(ks[7], (C,), jnp.float32),
    }


if __name__ == "__main__":
    key = jax.random.PRNGKey(0)
    k_x, k_p = jax.random.split(key)

    N, C, H, W = 2, 4, 16, 16                      # small NCHW input
    x = jax.random.normal(k_x, (N, C, H, W), jnp.float32)
    params = make_params(k_p, C)

    out = jax.block_until_ready(fmrb_forward(x, params))
    ref = jax.block_until_ready(fmrb_reference(x, params))

    assert out.shape == (N, C, H, W)
    assert bool(jnp.allclose(out, ref, atol=1e-2, rtol=1e-2)), \
        "Pallas FMRB output does not match JAX reference"
    print("KERNEL_OK")
</pallas_src>

<mosaic_0001>
module attributes {stable_mosaic.version = 11 : i64} {
  func.func @fmrb_kernel(%arg0: i32, %arg1: memref<1x400xf32, #tpu.memory_space<vmem>>, %arg2: memref<1x4x400xf32, #tpu.memory_space<vmem>>, %arg3: memref<8x4xf32, #tpu.memory_space<vmem>>, %arg4: memref<8x1xf32, #tpu.memory_space<vmem>>, %arg5: memref<5x5x8x8xf32, #tpu.memory_space<vmem>>, %arg6: memref<8x1xf32, #tpu.memory_space<vmem>>, %arg7: memref<4x8xf32, #tpu.memory_space<vmem>>, %arg8: memref<4x1xf32, #tpu.memory_space<vmem>>, %arg9: memref<1x4x400xf32, #tpu.memory_space<vmem>>, %arg10: memref<8x656xf32, #tpu.memory_space<vmem>>) attributes {dimension_semantics = [#tpu.dimension_semantics<parallel>], iteration_bounds = array<i64: 2>, scalar_prefetch = 0 : i64, scratch_operands = 1 : i64, tpu.core_type = #tpu.core_type<tc>, window_params = [{pipeline_mode = #tpu.pipeline_mode<synchronous>, transform_indices = @transform_0, window_bounds = array<i64: 1, 400>}, {transform_indices = @transform_1, window_bounds = array<i64: 1, 4, 400>}, {pipeline_mode = #tpu.pipeline_mode<synchronous>, transform_indices = @transform_2, window_bounds = array<i64: 8, 4>}, {pipeline_mode = #tpu.pipeline_mode<synchronous>, transform_indices = @transform_3, window_bounds = array<i64: 8, 1>}, {pipeline_mode = #tpu.pipeline_mode<synchronous>, transform_indices = @transform_4, window_bounds = array<i64: 5, 5, 8, 8>}, {pipeline_mode = #tpu.pipeline_mode<synchronous>, transform_indices = @transform_5, window_bounds = array<i64: 8, 1>}, {pipeline_mode = #tpu.pipeline_mode<synchronous>, transform_indices = @transform_6, window_bounds = array<i64: 4, 8>}, {pipeline_mode = #tpu.pipeline_mode<synchronous>, transform_indices = @transform_7, window_bounds = array<i64: 4, 1>}, {transform_indices = @transform_8, window_bounds = array<i64: 1, 4, 400>}]} {
    %c0_i32 = arith.constant 0 : i32
    %0 = arith.cmpi eq, %arg0, %c0_i32 : i32
    %1 = arith.extui %0 : i1 to i32
    %c0_i32_0 = arith.constant 0 : i32
    %2 = arith.cmpi ne, %1, %c0_i32_0 : i32
    scf.if %2 {
      %cst_174 = arith.constant 0.000000e+00 : f32
      %168 = vector.broadcast %cst_174 : f32 to vector<8x656xf32>
      %c0_175 = arith.constant 0 : index
      %c0_176 = arith.constant 0 : index
      %169 = vector.load %arg10[%c0_175, %c0_176] : memref<8x656xf32, #tpu.memory_space<vmem>>, vector<8x656xf32>
      tpu.vector_store %arg10[%c0_175, %c0_176], %168 {strides = array<i32>} : memref<8x656xf32, #tpu.memory_space<vmem>>, vector<8x656xf32>,
    } else {
    }
    %c0 = arith.constant 0 : index
    %c0_1 = arith.constant 0 : index
    %c0_2 = arith.constant 0 : index
    %3 = vector.load %arg2[%c0, %c0_1, %c0_2] : memref<1x4x400xf32, #tpu.memory_space<vmem>>, vector<1x4x400xf32>
    %4 = vector.shape_cast %3 : vector<1x4x400xf32> to vector<4x400xf32>
    %c0_3 = arith.constant 0 : index
    %c0_4 = arith.constant 0 : index
    %5 = vector.load %arg3[%c0_3, %c0_4] : memref<8x4xf32, #tpu.memory_space<vmem>>, vector<8x4xf32>
    %cst = arith.constant dense<0.000000e+00> : vector<8x400xf32>
    %6 = tpu.matmul %5, %4, %cst {dimension_numbers = #tpu.dot_dimension_numbers<[1], [0], [0], [1], [0, 0, 1, 1], [], []>} : vector<8x4xf32>, vector<4x400xf32>, vector<8x400xf32> -> vector<8x400xf32>
    %c0_5 = arith.constant 0 : index
    %c0_6 = arith.constant 0 : index
    %7 = vector.load %arg4[%c0_5, %c0_6] : memref<8x1xf32, #tpu.memory_space<vmem>>, vector<8x1xf32>
    %8 = vector.broadcast %7 : vector<8x1xf32> to vector<8x400xf32>
    %9 = arith.addf %6, %8 : vector<8x400xf32>
    %cst_7 = arith.constant 0.000000e+00 : f32
    %10 = vector.broadcast %cst_7 : f32 to vector<8x400xf32>
    %11 = arith.cmpf ogt, %9, %10 : vector<8x400xf32>
    %cst_8 = arith.constant 0.00999999977 : f32
    %12 = vector.broadcast %cst_8 : f32 to vector<8x400xf32>
    %13 = arith.mulf %12, %9 : vector<8x400xf32>
    %14 = arith.select %11, %9, %13 : vector<8x400xi1>, vector<8x400xf32>
    %c0_9 = arith.constant 0 : index
    %c0_10 = arith.constant 0 : index
    %15 = vector.load %arg1[%c0_9, %c0_10] : memref<1x400xf32, #tpu.memory_space<vmem>>, vector<1x400xf32>
    %16 = vector.broadcast %15 : vector<1x400xf32> to vector<8x400xf32>
    %17 = arith.mulf %14, %16 : vector<8x400xf32>
    %c0_11 = arith.constant 0 : index
    %c128 = arith.constant 128 : index
    %18 = vector.load %arg10[%c0_11, %c128] : memref<8x656xf32, #tpu.memory_space<vmem>>, vector<8x400xf32>
    tpu.vector_store %arg10[%c0_11, %c128], %17 {strides = array<i32>} : memref<8x656xf32, #tpu.memory_space<vmem>>, vector<8x400xf32>,
    %cst_12 = arith.constant 0.000000e+00 : f32
    %19 = vector.broadcast %cst_12 : f32 to vector<8x400xf32>
    %c0_13 = arith.constant 0 : index
    %c86 = arith.constant 86 : index
    %20 = vector.load %arg10[%c0_13, %c86] : memref<8x656xf32, #tpu.memory_space<vmem>>, vector<8x400xf32>
    %c0_14 = arith.constant 0 : index
    %c0_15 = arith.constant 0 : index
    %c0_16 = arith.constant 0 : index
    %c0_17 = arith.constant 0 : index
    %21 = vector.load %arg5[%c0_14, %c0_15, %c0_16, %c0_17] : memref<5x5x8x8xf32, #tpu.memory_space<vmem>>, vector<1x1x8x8xf32>
    %22 = vector.shape_cast %21 : vector<1x1x8x8xf32> to vector<8x8xf32>
    %cst_18 = arith.constant dense<0.000000e+00> : vector<8x400xf32>
    %23 = tpu.matmul %22, %20, %cst_18 {dimension_numbers = #tpu.dot_dimension_numbers<[1], [0], [0], [1], [0, 0, 1, 1], [], []>} : vector<8x8xf32>, vector<8x400xf32>, vector<8x400xf32> -> vector<8x400xf32>
    %24 = arith.addf %19, %23 : vector<8x400xf32>
    %c0_19 = arith.constant 0 : index
    %c87 = arith.constant 87 : index
    %25 = vector.load %arg10[%c0_19, %c87] : memref<8x656xf32, #tpu.memory_space<vmem>>, vector<8x400xf32>
    %c0_20 = arith.constant 0 : index
    %c1 = arith.constant 1 : index
    %c0_21 = arith.constant 0 : index
    %c0_22 = arith.constant 0 : index
    %26 = vector.load %arg5[%c0_20, %c1, %c0_21, %c0_22] : memref<5x5x8x8xf32, #tpu.memory_space<vmem>>, vector<1x1x8x8xf32>
    %27 = vector.shape_cast %26 : vector<1x1x8x8xf32> to vector<8x8xf32>
    %cst_23 = arith.constant dense<0.000000e+00> : vector<8x400xf32>
    %28 = tpu.matmul %27, %25, %cst_23 {dimension_numbers = #tpu.dot_dimension_numbers<[1], [0], [0], [1], [0, 0, 1, 1], [], []>} : vector<8x8xf32>, vector<8x400xf32>, vector<8x400xf32> -> vector<8x400xf32>
    %29 = arith.addf %24, %28 : vector<8x400xf32>
    %c0_24 = arith.constant 0 : index
    %c88 = arith.constant 88 : index
    %30 = vector.load %arg10[%c0_24, %c88] : memref<8x656xf32, #tpu.memory_space<vmem>>, vector<8x400xf32>
    %c0_25 = arith.constant 0 : index
    %c2 = arith.constant 2 : index
    %c0_26 = arith.constant 0 : index
    %c0_27 = arith.constant 0 : index
    %31 = vector.load %arg5[%c0_25, %c2, %c0_26, %c0_27] : memref<5x5x8x8xf32, #tpu.memory_space<vmem>>, vector<1x1x8x8xf32>
    %32 = vector.shape_cast %31 : vector<1x1x8x8xf32> to vector<8x8xf32>
    %cst_28 = arith.constant dense<0.000000e+00> : vector<8x400xf32>
    %33 = tpu.matmul %32, %30, %cst_28 {dimension_numbers = #tpu.dot_dimension_numbers<[1], [0], [0], [1], [0, 0, 1, 1], [], []>} : vector<8x8xf32>, vector<8x400xf32>, vector<8x400xf32> -> vector<8x400xf32>
    %34 = arith.addf %29, %33 : vector<8x400xf32>
    %c0_29 = arith.constant 0 : index
    %c89 = arith.constant 89 : index
    %35 = vector.load %arg10[%c0_29, %c89] : memref<8x656xf32, #tpu.memory_space<vmem>>, vector<8x400xf32>
    %c0_30 = arith.constant 0 : index
    %c3 = arith.constant 3 : index
    %c0_31 = arith.constant 0 : index
    %c0_32 = arith.constant 0 : index
    %36 = vector.load %arg5[%c0_30, %c3, %c0_31, %c0_32] : memref<5x5x8x8xf32, #tpu.memory_space<vmem>>, vector<1x1x8x8xf32>
    %37 = vector.shape_cast %36 : vector<1x1x8x8xf32> to vector<8x8xf32>
    %cst_33 = arith.constant dense<0.000000e+00> : vector<8x400xf32>
    %38 = tpu.matmul %37, %35, %cst_33 {dimension_numbers = #tpu.dot_dimension_numbers<[1], [0], [0], [1], [0, 0, 1, 1], [], []>} : vector<8x8xf32>, vector<8x400xf32>, vector<8x400xf32> -> vector<8x400xf32>
    %39 = arith.addf %34, %38 : vector<8x400xf32>
    %c0_34 = arith.constant 0 : index
    %c90 = arith.constant 90 : index
    %40 = vector.load %arg10[%c0_34, %c90] : memref<8x656xf32, #tpu.memory_space<vmem>>, vector<8x400xf32>
    %c0_35 = arith.constant 0 : index
    %c4 = arith.constant 4 : index
    %c0_36 = arith.constant 0 : index
    %c0_37 = arith.constant 0 : index
    %41 = vector.load %arg5[%c0_35, %c4, %c0_36, %c0_37] : memref<5x5x8x8xf32, #tpu.memory_space<vmem>>, vector<1x1x8x8xf32>
    %42 = vector.shape_cast %41 : vector<1x1x8x8xf32> to vector<8x8xf32>
    %cst_38 = arith.constant dense<0.000000e+00> : vector<8x400xf32>
    %43 = tpu.matmul %42, %40, %cst_38 {dimension_numbers = #tpu.dot_dimension_numbers<[1], [0], [0], [1], [0, 0, 1, 1], [], []>} : vector<8x8xf32>, vector<8x400xf32>, vector<8x400xf32> -> vector<8x400xf32>
    %44 = arith.addf %39, %43 : vector<8x400xf32>
    %c0_39 = arith.constant 0 : index
    %c106 = arith.constant 106 : index
    %45 = vector.load %arg10[%c0_39, %c106] : memref<8x656xf32, #tpu.memory_space<vmem>>, vector<8x400xf32>
    %c1_40 = arith.constant 1 : index
    %c0_41 = arith.constant 0 : index
    %c0_42 = arith.constant 0 : index
    %c0_43 = arith.constant 0 : index
    %46 = vector.load %arg5[%c1_40, %c0_41, %c0_42, %c0_43] : memref<5x5x8x8xf32, #tpu.memory_space<vmem>>, vector<1x1x8x8xf32>
    %47 = vector.shape_cast %46 : vector<1x1x8x8xf32> to vector<8x8xf32>
    %cst_44 = arith.constant dense<0.000000e+00> : vector<8x400xf32>
    %48 = tpu.matmul %47, %45, %cst_44 {dimension_numbers = #tpu.dot_dimension_numbers<[1], [0], [0], [1], [0, 0, 1, 1], [], []>} : vector<8x8xf32>, vector<8x400xf32>, vector<8x400xf32> -> vector<8x400xf32>
    %49 = arith.addf %44, %48 : vector<8x400xf32>
    %c0_45 = arith.constant 0 : index
    %c107 = arith.constant 107 : index
    %50 = vector.load %arg10[%c0_45, %c107] : memref<8x656xf32, #tpu.memory_space<vmem>>, vector<8x400xf32>
    %c1_46 = arith.constant 1 : index
    %c1_47 = arith.constant 1 : index
    %c0_48 = arith.constant 0 : index
    %c0_49 = arith.constant 0 : index
    %51 = vector.load %arg5[%c1_46, %c1_47, %c0_48, %c0_49] : memref<5x5x8x8xf32, #tpu.memory_space<vmem>>, vector<1x1x8x8xf32>
    %52 = vector.shape_cast %51 : vector<1x1x8x8xf32> to vector<8x8xf32>
    %cst_50 = arith.constant dense<0.000000e+00> : vector<8x400xf32>
    %53 = tpu.matmul %52, %50, %cst_50 {dimension_numbers = #tpu.dot_dimension_numbers<[1], [0], [0], [1], [0, 0, 1, 1], [], []>} : vector<8x8xf32>, vector<8x400xf32>, vector<8x400xf32> -> vector<8x400xf32>
    %54 = arith.addf %49, %53 : vector<8x400xf32>
    %c0_51 = arith.constant 0 : index
    %c108 = arith.constant 108 : index
    %55 = vector.load %arg10[%c0_51, %c108] : memref<8x656xf32, #tpu.memory_space<vmem>>, vector<8x400xf32>
    %c1_52 = arith.constant 1 : index
    %c2_53 = arith.constant 2 : index
    %c0_54 = arith.constant 0 : index
    %c0_55 = arith.constant 0 : index
    %56 = vector.load %arg5[%c1_52, %c2_53, %c0_54, %c0_55] : memref<5x5x8x8xf32, #tpu.memory_space<vmem>>, vector<1x1x8x8xf32>
    %57 = vector.shape_cast %56 : vector<1x1x8x8xf32> to vector<8x8xf32>
    %cst_56 = arith.constant dense<0.000000e+00> : vector<8x400xf32>
    %58 = tpu.matmul %57, %55, %cst_56 {dimension_numbers = #tpu.dot_dimension_numbers<[1], [0], [0], [1], [0, 0, 1, 1], [], []>} : vector<8x8xf32>, vector<8x400xf32>, vector<8x400xf32> -> vector<8x400xf32>
    %59 = arith.addf %54, %58 : vector<8x400xf32>
    %c0_57 = arith.constant 0 : index
    %c109 = arith.constant 109 : index
    %60 = vector.load %arg10[%c0_57, %c109] : memref<8x656xf32, #tpu.memory_space<vmem>>, vector<8x400xf32>
    %c1_58 = arith.constant 1 : index
    %c3_59 = arith.constant 3 : index
    %c0_60 = arith.constant 0 : index
    %c0_61 = arith.constant 0 : index
    %61 = vector.load %arg5[%c1_58, %c3_59, %c0_60, %c0_61] : memref<5x5x8x8xf32, #tpu.memory_space<vmem>>, vector<1x1x8x8xf32>
    %62 = vector.shape_cast %61 : vector<1x1x8x8xf32> to vector<8x8xf32>
    %cst_62 = arith.constant dense<0.000000e+00> : vector<8x400xf32>
    %63 = tpu.matmul %62, %60, %cst_62 {dimension_numbers = #tpu.dot_dimension_numbers<[1], [0], [0], [1], [0, 0, 1, 1], [], []>} : vector<8x8xf32>, vector<8x400xf32>, vector<8x400xf32> -> vector<8x400xf32>
    %64 = arith.addf %59, %63 : vector<8x400xf32>
    %c0_63 = arith.constant 0 : index
    %c110 = arith.constant 110 : index
    %65 = vector.load %arg10[%c0_63, %c110] : memref<8x656xf32, #tpu.memory_space<vmem>>, vector<8x400xf32>
    %c1_64 = arith.constant 1 : index
    %c4_65 = arith.constant 4 : index
    %c0_66 = arith.constant 0 : index
    %c0_67 = arith.constant 0 : index
    %66 = vector.load %arg5[%c1_64, %c4_65, %c0_66, %c0_67] : memref<5x5x8x8xf32, #tpu.memory_space<vmem>>, vector<1x1x8x8xf32>
    %67 = vector.shape_cast %66 : vector<1x1x8x8xf32> to vector<8x8xf32>
    %cst_68 = arith.constant dense<0.000000e+00> : vector<8x400xf32>
    %68 = tpu.matmul %67, %65, %cst_68 {dimension_numbers = #tpu.dot_dimension_numbers<[1], [0], [0], [1], [0, 0, 1, 1], [], []>} : vector<8x8xf32>, vector<8x400xf32>, vector<8x400xf32> -> vector<8x400xf32>
    %69 = arith.addf %64, %68 : vector<8x400xf32>
    %c0_69 = arith.constant 0 : index
    %c126 = arith.constant 126 : index
    %70 = vector.load %arg10[%c0_69, %c126] : memref<8x656xf32, #tpu.memory_space<vmem>>, vector<8x400xf32>
    %c2_70 = arith.constant 2 : index
    %c0_71 = arith.constant 0 : index
    %c0_72 = arith.constant 0 : index
    %c0_73 = arith.constant 0 : index
    %71 = vector.load %arg5[%c2_70, %c0_71, %c0_72, %c0_73] : memref<5x5x8x8xf32, #tpu.memory_space<vmem>>, vector<1x1x8x8xf32>
    %72 = vector.shape_cast %71 : vector<1x1x8x8xf32> to vector<8x8xf32>
    %cst_74 = arith.constant dense<0.000000e+00> : vector<8x400xf32>
    %73 = tpu.matmul %72, %70, %cst_74 {dimension_numbers = #tpu.dot_dimension_numbers<[1], [0], [0], [1], [0, 0, 1, 1], [], []>} : vector<8x8xf32>, vector<8x400xf32>, vector<8x400xf32> -> vector<8x400xf32>
    %74 = arith.addf %69, %73 : vector<8x400xf32>
    %c0_75 = arith.constant 0 : index
    %c127 = arith.constant 127 : index
    %75 = vector.load %arg10[%c0_75, %c127] : memref<8x656xf32, #tpu.memory_space<vmem>>, vector<8x400xf32>
    %c2_76 = arith.constant 2 : index
    %c1_77 = arith.constant 1 : index
    %c0_78 = arith.constant 0 : index
    %c0_79 = arith.constant 0 : index
    %76 = vector.load %arg5[%c2_76, %c1_77, %c0_78, %c0_79] : memref<5x5x8x8xf32, #tpu.memory_space<vmem>>, vector<1x1x8x8xf32>
    %77 = vector.shape_cast %76 : vector<1x1x8x8xf32> to vector<8x8xf32>
    %cst_80 = arith.constant dense<0.000000e+00> : vector<8x400xf32>
    %78 = tpu.matmul %77, %75, %cst_80 {dimension_numbers = #tpu.dot_dimension_numbers<[1], [0], [0], [1], [0, 0, 1, 1], [], []>} : vector<8x8xf32>, vector<8x400xf32>, vector<8x400xf32> -> vector<8x400xf32>
    %79 = arith.addf %74, %78 : vector<8x400xf32>
    %c0_81 = arith.constant 0 : index
    %c128_82 = arith.constant 128 : index
    %80 = vector.load %arg10[%c0_81, %c128_82] : memref<8x656xf32, #tpu.memory_space<vmem>>, vector<8x400xf32>
    %c2_83 = arith.constant 2 : index
    %c2_84 = arith.constant 2 : index
    %c0_85 = arith.constant 0 : index
    %c0_86 = arith.constant 0 : index
    %81 = vector.load %arg5[%c2_83, %c2_84, %c0_85, %c0_86] : memref<5x5x8x8xf32, #tpu.memory_space<vmem>>, vector<1x1x8x8xf32>
    %82 = vector.shape_cast %81 : vector<1x1x8x8xf32> to vector<8x8xf32>
    %cst_87 = arith.constant dense<0.000000e+00> : vector<8x400xf32>
    %83 = tpu.matmul %82, %80, %cst_87 {dimension_numbers = #tpu.dot_dimension_numbers<[1], [0], [0], [1], [0, 0, 1, 1], [], []>} : vector<8x8xf32>, vector<8x400xf32>, vector<8x400xf32> -> vector<8x400xf32>
    %84 = arith.addf %79, %83 : vector<8x400xf32>
    %c0_88 = arith.constant 0 : index
    %c129 = arith.constant 129 : index
    %85 = vector.load %arg10[%c0_88, %c129] : memref<8x656xf32, #tpu.memory_space<vmem>>, vector<8x400xf32>
    %c2_89 = arith.constant 2 : index
    %c3_90 = arith.constant 3 : index
    %c0_91 = arith.constant 0 : index
    %c0_92 = arith.constant 0 : index
    %86 = vector.load %arg5[%c2_89, %c3_90, %c0_91, %c0_92] : memref<5x5x8x8xf32, #tpu.memory_space<vmem>>, vector<1x1x8x8xf32>
    %87 = vector.shape_cast %86 : vector<1x1x8x8xf32> to vector<8x8xf32>
    %cst_93 = arith.constant dense<0.000000e+00> : vector<8x400xf32>
    %88 = tpu.matmul %87, %85, %cst_93 {dimension_numbers = #tpu.dot_dimension_numbers<[1], [0], [0], [1], [0, 0, 1, 1], [], []>} : vector<8x8xf32>, vector<8x400xf32>, vector<8x400xf32> -> vector<8x400xf32>
    %89 = arith.addf %84, %88 : vector<8x400xf32>
    %c0_94 = arith.constant 0 : index
    %c130 = arith.constant 130 : index
    %90 = vector.load %arg10[%c0_94, %c130] : memref<8x656xf32, #tpu.memory_space<vmem>>, vector<8x400xf32>
    %c2_95 = arith.constant 2 : index
    %c4_96 = arith.constant 4 : index
    %c0_97 = arith.constant 0 : index
    %c0_98 = arith.constant 0 : index
    %91 = vector.load %arg5[%c2_95, %c4_96, %c0_97, %c0_98] : memref<5x5x8x8xf32, #tpu.memory_space<vmem>>, vector<1x1x8x8xf32>
    %92 = vector.shape_cast %91 : vector<1x1x8x8xf32> to vector<8x8xf32>
    %cst_99 = arith.constant dense<0.000000e+00> : vector<8x400xf32>
    %93 = tpu.matmul %92, %90, %cst_99 {dimension_numbers = #tpu.dot_dimension_numbers<[1], [0], [0], [1], [0, 0, 1, 1], [], []>} : vector<8x8xf32>, vector<8x400xf32>, vector<8x400xf32> -> vector<8x400xf32>
    %94 = arith.addf %89, %93 : vector<8x400xf32>
    %c0_100 = arith.constant 0 : index
    %c146 = arith.constant 146 : index
    %95 = vector.load %arg10[%c0_100, %c146] : memref<8x656xf32, #tpu.memory_space<vmem>>, vector<8x400xf32>
    %c3_101 = arith.constant 3 : index
    %c0_102 = arith.constant 0 : index
    %c0_103 = arith.constant 0 : index
    %c0_104 = arith.constant 0 : index
    %96 = vector.load %arg5[%c3_101, %c0_102, %c0_103, %c0_104] : memref<5x5x8x8xf32, #tpu.memory_space<vmem>>, vector<1x1x8x8xf32>
    %97 = vector.shape_cast %96 : vector<1x1x8x8xf32> to vector<8x8xf32>
    %cst_105 = arith.constant dense<0.000000e+00> : vector<8x400xf32>
    %98 = tpu.matmul %97, %95, %cst_105 {dimension_numbers = #tpu.dot_dimension_numbers<[1], [0], [0], [1], [0, 0, 1, 1], [], []>} : vector<8x8xf32>, vector<8x400xf32>, vector<8x400xf32> -> vector<8x400xf32>
    %99 = arith.addf %94, %98 : vector<8x400xf32>
    %c0_106 = arith.constant 0 : index
    %c147 = arith.constant 147 : index
    %100 = vector.load %arg10[%c0_106, %c147] : memref<8x656xf32, #tpu.memory_space<vmem>>, vector<8x400xf32>
    %c3_107 = arith.constant 3 : index
    %c1_108 = arith.constant 1 : index
    %c0_109 = arith.constant 0 : index
    %c0_110 = arith.constant 0 : index
    %101 = vector.load %arg5[%c3_107, %c1_108, %c0_109, %c0_110] : memref<5x5x8x8xf32, #tpu.memory_space<vmem>>, vector<1x1x8x8xf32>
    %102 = vector.shape_cast %101 : vector<1x1x8x8xf32> to vector<8x8xf32>
    %cst_111 = arith.constant dense<0.000000e+00> : vector<8x400xf32>
    %103 = tpu.matmul %102, %100, %cst_111 {dimension_numbers = #tpu.dot_dimension_numbers<[1], [0], [0], [1], [0, 0, 1, 1], [], []>} : vector<8x8xf32>, vector<8x400xf32>, vector<8x400xf32> -> vector<8x400xf32>
    %104 = arith.addf %99, %103 : vector<8x400xf32>
    %c0_112 = arith.constant 0 : index
    %c148 = arith.constant 148 : index
    %105 = vector.load %arg10[%c0_112, %c148] : memref<8x656xf32, #tpu.memory_space<vmem>>, vector<8x400xf32>
    %c3_113 = arith.constant 3 : index
    %c2_114 = arith.constant 2 : index
    %c0_115 = arith.constant 0 : index
    %c0_116 = arith.constant 0 : index
    %106 = vector.load %arg5[%c3_113, %c2_114, %c0_115, %c0_116] : memref<5x5x8x8xf32, #tpu.memory_space<vmem>>, vector<1x1x8x8xf32>
    %107 = vector.shape_cast %106 : vector<1x1x8x8xf32> to vector<8x8xf32>
    %cst_117 = arith.constant dense<0.000000e+00> : vector<8x400xf32>
    %108 = tpu.matmul %107, %105, %cst_117 {dimension_numbers = #tpu.dot_dimension_numbers<[1], [0], [0], [1], [0, 0, 1, 1], [], []>} : vector<8x8xf32>, vector<8x400xf32>, vector<8x400xf32> -> vector<8x400xf32>
    %109 = arith.addf %104, %108 : vector<8x400xf32>
    %c0_118 = arith.constant 0 : index
    %c149 = arith.constant 149 : index
    %110 = vector.load %arg10[%c0_118, %c149] : memref<8x656xf32, #tpu.memory_space<vmem>>, vector<8x400xf32>
    %c3_119 = arith.constant 3 : index
    %c3_120 = arith.constant 3 : index
    %c0_121 = arith.constant 0 : index
    %c0_122 = arith.constant 0 : index
    %111 = vector.load %arg5[%c3_119, %c3_120, %c0_121, %c0_122] : memref<5x5x8x8xf32, #tpu.memory_space<vmem>>, vector<1x1x8x8xf32>
    %112 = vector.shape_cast %111 : vector<1x1x8x8xf32> to vector<8x8xf32>
    %cst_123 = arith.constant dense<0.000000e+00> : vector<8x400xf32>
    %113 = tpu.matmul %112, %110, %cst_123 {dimension_numbers = #tpu.dot_dimension_numbers<[1], [0], [0], [1], [0, 0, 1, 1], [], []>} : vector<8x8xf32>, vector<8x400xf32>, vector<8x400xf32> -> vector<8x400xf32>
    %114 = arith.addf %109, %113 : vector<8x400xf32>
    %c0_124 = arith.constant 0 : index
    %c150 = arith.constant 150 : index
    %115 = vector.load %arg10[%c0_124, %c150] : memref<8x656xf32, #tpu.memory_space<vmem>>, vector<8x400xf32>
    %c3_125 = arith.constant 3 : index
    %c4_126 = arith.constant 4 : index
    %c0_127 = arith.constant 0 : index
    %c0_128 = arith.constant 0 : index
    %116 = vector.load %arg5[%c3_125, %c4_126, %c0_127, %c0_128] : memref<5x5x8x8xf32, #tpu.memory_space<vmem>>, vector<1x1x8x8xf32>
    %117 = vector.shape_cast %116 : vector<1x1x8x8xf32> to vector<8x8xf32>
    %cst_129 = arith.constant dense<0.000000e+00> : vector<8x400xf32>
    %118 = tpu.matmul %117, %115, %cst_129 {dimension_numbers = #tpu.dot_dimension_numbers<[1], [0], [0], [1], [0, 0, 1, 1], [], []>} : vector<8x8xf32>, vector<8x400xf32>, vector<8x400xf32> -> vector<8x400xf32>
    %119 = arith.addf %114, %118 : vector<8x400xf32>
    %c0_130 = arith.constant 0 : index
    %c166 = arith.constant 166 : index
    %120 = vector.load %arg10[%c0_130, %c166] : memref<8x656xf32, #tpu.memory_space<vmem>>, vector<8x400xf32>
    %c4_131 = arith.constant 4 : index
    %c0_132 = arith.constant 0 : index
    %c0_133 = arith.constant 0 : index
    %c0_134 = arith.constant 0 : index
    %121 = vector.load %arg5[%c4_131, %c0_132, %c0_133, %c0_134] : memref<5x5x8x8xf32, #tpu.memory_space<vmem>>, vector<1x1x8x8xf32>
    %122 = vector.shape_cast %121 : vector<1x1x8x8xf32> to vector<8x8xf32>
    %cst_135 = arith.constant dense<0.000000e+00> : vector<8x400xf32>
    %123 = tpu.matmul %122, %120, %cst_135 {dimension_numbers = #tpu.dot_dimension_numbers<[1], [0], [0], [1], [0, 0, 1, 1], [], []>} : vector<8x8xf32>, vector<8x400xf32>, vector<8x400xf32> -> vector<8x400xf32>
    %124 = arith.addf %119, %123 : vector<8x400xf32>
    %c0_136 = arith.constant 0 : index
    %c167 = arith.constant 167 : index
    %125 = vector.load %arg10[%c0_136, %c167] : memref<8x656xf32, #tpu.memory_space<vmem>>, vector<8x400xf32>
    %c4_137 = arith.constant 4 : index
    %c1_138 = arith.constant 1 : index
    %c0_139 = arith.constant 0 : index
    %c0_140 = arith.constant 0 : index
    %126 = vector.load %arg5[%c4_137, %c1_138, %c0_139, %c0_140] : memref<5x5x8x8xf32, #tpu.memory_space<vmem>>, vector<1x1x8x8xf32>
    %127 = vector.shape_cast %126 : vector<1x1x8x8xf32> to vector<8x8xf32>
    %cst_141 = arith.constant dense<0.000000e+00> : vector<8x400xf32>
    %128 = tpu.matmul %127, %125, %cst_141 {dimension_numbers = #tpu.dot_dimension_numbers<[1], [0], [0], [1], [0, 0, 1, 1], [], []>} : vector<8x8xf32>, vector<8x400xf32>, vector<8x400xf32> -> vector<8x400xf32>
    %129 = arith.addf %124, %128 : vector<8x400xf32>
    %c0_142 = arith.constant 0 : index
    %c168 = arith.constant 168 : index
    %130 = vector.load %arg10[%c0_142, %c168] : memref<8x656xf32, #tpu.memory_space<vmem>>, vector<8x400xf32>
    %c4_143 = arith.constant 4 : index
    %c2_144 = arith.constant 2 : index
    %c0_145 = arith.constant 0 : index
    %c0_146 = arith.constant 0 : index
    %131 = vector.load %arg5[%c4_143, %c2_144, %c0_145, %c0_146] : memref<5x5x8x8xf32, #tpu.memory_space<vmem>>, vector<1x1x8x8xf32>
    %132 = vector.shape_cast %131 : vector<1x1x8x8xf32> to vector<8x8xf32>
    %cst_147 = arith.constant dense<0.000000e+00> : vector<8x400xf32>
    %133 = tpu.matmul %132, %130, %cst_147 {dimension_numbers = #tpu.dot_dimension_numbers<[1], [0], [0], [1], [0, 0, 1, 1], [], []>} : vector<8x8xf32>, vector<8x400xf32>, vector<8x400xf32> -> vector<8x400xf32>
    %134 = arith.addf %129, %133 : vector<8x400xf32>
    %c0_148 = arith.constant 0 : index
    %c169 = arith.constant 169 : index
    %135 = vector.load %arg10[%c0_148, %c169] : memref<8x656xf32, #tpu.memory_space<vmem>>, vector<8x400xf32>
    %c4_149 = arith.constant 4 : index
    %c3_150 = arith.constant 3 : index
    %c0_151 = arith.constant 0 : index
    %c0_152 = arith.constant 0 : index
    %136 = vector.load %arg5[%c4_149, %c3_150, %c0_151, %c0_152] : memref<5x5x8x8xf32, #tpu.memory_space<vmem>>, vector<1x1x8x8xf32>
    %137 = vector.shape_cast %136 : vector<1x1x8x8xf32> to vector<8x8xf32>
    %cst_153 = arith.constant dense<0.000000e+00> : vector<8x400xf32>
    %138 = tpu.matmul %137, %135, %cst_153 {dimension_numbers = #tpu.dot_dimension_numbers<[1], [0], [0], [1], [0, 0, 1, 1], [], []>} : vector<8x8xf32>, vector<8x400xf32>, vector<8x400xf32> -> vector<8x400xf32>
    %139 = arith.addf %134, %138 : vector<8x400xf32>
    %c0_154 = arith.constant 0 : index
    %c170 = arith.constant 170 : index
    %140 = vector.load %arg10[%c0_154, %c170] : memref<8x656xf32, #tpu.memory_space<vmem>>, vector<8x400xf32>
    %c4_155 = arith.constant 4 : index
    %c4_156 = arith.constant 4 : index
    %c0_157 = arith.constant 0 : index
    %c0_158 = arith.constant 0 : index
    %141 = vector.load %arg5[%c4_155, %c4_156, %c0_157, %c0_158] : memref<5x5x8x8xf32, #tpu.memory_space<vmem>>, vector<1x1x8x8xf32>
    %142 = vector.shape_cast %141 : vector<1x1x8x8xf32> to vector<8x8xf32>
    %cst_159 = arith.constant dense<0.000000e+00> : vector<8x400xf32>
    %143 = tpu.matmul %142, %140, %cst_159 {dimension_numbers = #tpu.dot_dimension_numbers<[1], [0], [0], [1], [0, 0, 1, 1], [], []>} : vector<8x8xf32>, vector<8x400xf32>, vector<8x400xf32> -> vector<8x400xf32>
    %144 = arith.addf %139, %143 : vector<8x400xf32>
    %c0_160 = arith.constant 0 : index
    %c0_161 = arith.constant 0 : index
    %145 = vector.load %arg6[%c0_160, %c0_161] : memref<8x1xf32, #tpu.memory_space<vmem>>, vector<8x1xf32>
    %146 = vector.broadcast %145 : vector<8x1xf32> to vector<8x400xf32>
    %147 = arith.addf %144, %146 : vector<8x400xf32>
    %cst_162 = arith.constant 0.000000e+00 : f32
    %148 = vector.broadcast %cst_162 : f32 to vector<8x400xf32>
    %149 = arith.cmpf ogt, %147, %148 : vector<8x400xf32>
    %cst_163 = arith.constant 0.00999999977 : f32
    %150 = vector.broadcast %cst_163 : f32 to vector<8x400xf32>
    %151 = arith.mulf %150, %147 : vector<8x400xf32>
    %152 = arith.select %149, %147, %151 : vector<8x400xi1>, vector<8x400xf32>
    %153 = arith.addf %17, %152 : vector<8x400xf32>
    %c0_164 = arith.constant 0 : index
    %c0_165 = arith.constant 0 : index
    %154 = vector.load %arg7[%c0_164, %c0_165] : memref<4x8xf32, #tpu.memory_space<vmem>>, vector<4x8xf32>
    %cst_166 = arith.constant dense<0.000000e+00> : vector<4x400xf32>
    %155 = tpu.matmul %154, %153, %cst_166 {dimension_numbers = #tpu.dot_dimension_numbers<[1], [0], [0], [1], [0, 0, 1, 1], [], []>} : vector<4x8xf32>, vector<8x400xf32>, vector<4x400xf32> -> vector<4x400xf32>
    %c0_167 = arith.constant 0 : index
    %c0_168 = arith.constant 0 : index
    %156 = vector.load %arg8[%c0_167, %c0_168] : memref<4x1xf32, #tpu.memory_space<vmem>>, vector<4x1xf32>
    %157 = vector.broadcast %156 : vector<4x1xf32> to vector<4x400xf32>
    %158 = arith.addf %155, %157 : vector<4x400xf32>
    %cst_169 = arith.constant 0.000000e+00 : f32
    %159 = vector.broadcast %cst_169 : f32 to vector<4x400xf32>
    %160 = arith.cmpf ogt, %158, %159 : vector<4x400xf32>
    %cst_170 = arith.constant 0.00999999977 : f32
    %161 = vector.broadcast %cst_170 : f32 to vector<4x400xf32>
    %162 = arith.mulf %161, %158 : vector<4x400xf32>
    %163 = arith.select %160, %158, %162 : vector<4x400xi1>, vector<4x400xf32>
    %164 = arith.addf %4, %163 : vector<4x400xf32>
    %c0_171 = arith.constant 0 : index
    %c0_172 = arith.constant 0 : index
    %c0_173 = arith.constant 0 : index
    %165 = vector.load %arg9[%c0_171, %c0_172, %c0_173] : memref<1x4x400xf32, #tpu.memory_space<vmem>>, vector<1x4x400xf32>
    %166 = vector.shape_cast %165 : vector<1x4x400xf32> to vector<4x400xf32>
    %167 = vector.shape_cast %164 : vector<4x400xf32> to vector<1x4x400xf32>
    tpu.vector_store %arg9[%c0_171, %c0_172, %c0_173], %167 {strides = array<i32>} : memref<1x4x400xf32, #tpu.memory_space<vmem>>, vector<1x4x400xf32>,
    return
  }
  func.func @transform_0(%arg0: i32) -> (i32, i32) {
    %c0_i32 = arith.constant 0 : i32
    %c0_i32_0 = arith.constant 0 : i32
    %c0_i32_1 = arith.constant 0 : i32
    return %c0_i32, %c0_i32_0 : i32, i32
  }
  func.func @transform_1(%arg0: i32) -> (i32, i32, i32) {
    %c0_i32 = arith.constant 0 : i32
    %c0_i32_0 = arith.constant 0 : i32
    %c0_i32_1 = arith.constant 0 : i32
    return %arg0, %c0_i32, %c0_i32_0 : i32, i32, i32
  }
  func.func @transform_2(%arg0: i32) -> (i32, i32) {
    %c0_i32 = arith.constant 0 : i32
    %c0_i32_0 = arith.constant 0 : i32
    %c0_i32_1 = arith.constant 0 : i32
    return %c0_i32, %c0_i32_0 : i32, i32
  }
  func.func @transform_3(%arg0: i32) -> (i32, i32) {
    %c0_i32 = arith.constant 0 : i32
    %c0_i32_0 = arith.constant 0 : i32
    %c0_i32_1 = arith.constant 0 : i32
    return %c0_i32, %c0_i32_0 : i32, i32
  }
  func.func @transform_4(%arg0: i32) -> (i32, i32, i32, i32) {
    %c0_i32 = arith.constant 0 : i32
    %c0_i32_0 = arith.constant 0 : i32
    %c0_i32_1 = arith.constant 0 : i32
    %c0_i32_2 = arith.constant 0 : i32
    %c0_i32_3 = arith.constant 0 : i32
    return %c0_i32, %c0_i32_0, %c0_i32_1, %c0_i32_2 : i32, i32, i32, i32
  }
  func.func @transform_5(%arg0: i32) -> (i32, i32) {
    %c0_i32 = arith.constant 0 : i32
    %c0_i32_0 = arith.constant 0 : i32
    %c0_i32_1 = arith.constant 0 : i32
    return %c0_i32, %c0_i32_0 : i32, i32
  }
  func.func @transform_6(%arg0: i32) -> (i32, i32) {
    %c0_i32 = arith.constant 0 : i32
    %c0_i32_0 = arith.constant 0 : i32
    %c0_i32_1 = arith.constant 0 : i32
    return %c0_i32, %c0_i32_0 : i32, i32
  }
  func.func @transform_7(%arg0: i32) -> (i32, i32) {
    %c0_i32 = arith.constant 0 : i32
    %c0_i32_0 = arith.constant 0 : i32
    %c0_i32_1 = arith.constant 0 : i32
    return %c0_i32, %c0_i32_0 : i32, i32
  }
  func.func @transform_8(%arg0: i32) -> (i32, i32, i32) {
    %c0_i32 = arith.constant 0 : i32
    %c0_i32_0 = arith.constant 0 : i32
    %c0_i32_1 = arith.constant 0 : i32
    return %arg0, %c0_i32, %c0_i32_0 : i32, i32, i32
  }
}

</mosaic_0001>

<bundles_post_ra>
// kernel: tpu_custom_call.1
= control target key start
LH: loop header
LB: loop body
LE: loop exit
PB: predicated region body
PF: predicated region fallthrough
CT: control target
= control target key end

     0   :  { %13 = vsyncpa [#allocation4], 0  ;;  %s5886_s0 = inlined_call_operand.vmem [shape: f32[1,400], index: 0, kind: input, shape index: {}]   ;;  %s5887_s1 = inlined_call_operand.vmem [shape: f32[2,4,400], index: 1, kind: input, shape index: {}]   ;;  %s5888_s2 = inlined_call_operand.vmem [shape: f32[8,4], index: 2, kind: input, shape index: {}]   ;;  %s5889_s3 = inlined_call_operand.vmem [shape: f32[8,1], index: 3, kind: input, shape index: {}]   ;;  %s5890_s4 = inlined_call_operand.hbm [shape: f32[5,5,8,8], index: 4, kind: input, shape index: {}]   ;;  %s5891_s5 = inlined_call_operand.vmem [shape: f32[8,1], index: 5, kind: input, shape index: {}]   ;;  %s5892_s6 = inlined_call_operand.vmem [shape: f32[4,8], index: 6, kind: input, shape index: {}]   ;;  %s5893_s7 = inlined_call_operand.vmem [shape: f32[4,1], index: 7, kind: input, shape index: {}]   ;;  %s5894_s8 = inlined_call_operand.hbm [shape: f32[2,4,400], index: 8, kind: output, shape index: {}]  }
   0x1   :  { %14 = vsyncpa [#allocation5], 0 }
   0x2   :  { %16 = vsyncpa [#allocation5 + $0x1], 0  ;;  %s5437_s27 = smov 0   ;;  %s5439_s28 = smov 0  }
   0x3   :  { %s5441_s29 = smov 0   ;;  %s5443_s30 = smov 0  }
   0x4 LB: > { %s5458_s9 = sadd.s32 4294967295, %s5359_s30   ;;  %s5006_s10 = sadd.s32 4294967294, %s5359_s30   ;;  %s5359_s30 = sphi %s5443_s30, %s5911_s30   ;;  %s5355_s29 = sphi %s5441_s29, %s5910_s29   ;;  %s5351_s28 = sphi %s5439_s28, %s5909_s28   ;;  %s5347_s27 = sphi %s5437_s27, %s5908_s27  }
   0x5   : > { %s5462_s11 = sadd.s32 1, %s5359_s30   ;;  %s202_s12 = sadd.s32 1, %s5355_s29 }
   0x6   : > { %s199_s13 = ssub.s32 %s5359_s30, %s5462_s11  ;;  %p212_p0 = scmp.ne.s32.totalorder %s5355_s29, %s5351_s28 }
   0x7   : > { %p200_p1 = scmp.eq.s32.totalorder %s199_s13, 0  ;;  %p213_p2 = scmp.eq.s32.totalorder %s5458_s9, 1 }
   0x8   : > { %p218_p3 = scmp.ne.s32.totalorder %s5351_s28, %s5347_s27  ;;  %p219_p4 = scmp.eq.s32.totalorder %s5006_s10, 1 }
   0x9   : > { %s5473_s14 = scalar_select %p200_p1, %s5355_s29, %s202_s12  }
   0xa   : > { %p5475_p5 = por %p213_p2, %p212_p0  ;;  %p5479_p6 = por %p219_p4, %p218_p3 }
   0xb   : > { %p5007_p7 = scmp.ge.s32.totalorder %s5359_s30, 1  ;;  %p226_p8 = scmp.lt.s32.totalorder %s5359_s30, 3 }
   0xc   : > { %s5898_s15 = scalar_select %p5475_p5, 1, 0 }
   0xd   : > { %s5899_s16 = scalar_select %p5479_p6, 1, 0 }
   0xe   : > { %p5895_p10 = scmp.eq.s32.totalorder %s5458_s9, 0  ;;  %p5487_p11 = pnand %p5007_p7, %p226_p8 }
   0xf   : > { %s5361_s18 = smov [#allocation3]   ;;  %s5265_s23 = scalar_lea.hbm %s5890_s4, 3200 }
  0x10   : > { %s5900_s17 = scalar_select %p5487_p11, 1, 0 }
  0x11   : > { %s247_s19 = sshll.u32 %s5361_s18, 4  ;;  %p5183_p12 = pneg %p5487_p11  ;;  %s248_s19 = int_to_ptr.vmem [resolvable:$true] %s247_s19 }
  0x12   : > { %p5266_p0 = scmp.ne.s32.totalorder %s5890_s4, %s5265_s23  ;;  %p5272_p4 = scmp.lt.u32.totalorder %s5265_s23, %s5890_s4 }
  0x13   : > { %p5495_p13 = pnand %p5895_p10, %p5183_p12 }
  0x15   : > { %p5267_p1 = pneg %p5495_p13 }
  0x17   : > { %p5268_p2 = pnand %p5267_p1, %p5266_p0 }
  0x19   : > { %p5269_p3 = pneg %p5268_p2 }
  0x1b   : > { %p5274_p7 = pnand %p5272_p4, %p5269_p3 }
  0x1d   : > { %5277 = shalt.err (!%p5274_p7)
}
  0x1e   : > { %s5278_s12 = scalar_lea.vmem %s248_s19, 3200  ;;  %p5286_p10 = scmp.lt.s32.totalorder %s248_s19, %s248_s19 }
  0x1f   : > { %p5279_p8 = scmp.ne.s32.totalorder %s248_s19, %s5278_s12  ;;  %p5287_p6 = scmp.lt.s32.totalorder %s5278_s12, %s5278_s12 }
  0x21   : > { %p5281_p12 = pnand %p5279_p8, %p5267_p1  ;;  %p5288_p5 = por %p5287_p6, %p5286_p10 }
  0x23   : > { %p5282_p9 = pneg %p5281_p12 }
  0x25   : > { %p5289_p11 = pnand %p5288_p5, %p5282_p9 }
  0x27   : > { %5292 = shalt.err (!%p5289_p11)
}
  0x28   : > { %s5362_s13 = smov 128   ;;  %s5363_s18 = smov 8  }
  0x29   : > { %5186 = dma.hbm_to_vmem [thread:$0]  (!%p5495_p13), %s5890_s4, 3200, %s248_s19, [#allocation4], %s5362_s13, %s5362_s13, %s5363_s18  }
  0x2a   : > { %p5902_p0 = scmp.ne.s32.totalorder %s5900_s17, 0 }
  0x2b   : > { %p5903_p2 = scmp.eq.s32.totalorder (!%p5902_p0), %s5458_s9, 0 }
  0x2c   : > { %280 = sbr.rel (%p5902_p0) target bundleno = 1061 (0x425), region = 52 }
  0x33   : > { %5338 = dma.done.wait (%p5903_p2), [#allocation4], 3200   ;;  %p5904_p1 = pmov %p5903_p2 }
  0x34   : > { %s311_s23 = sand.u32 1, %s5351_s28   ;;  %p314_p5 = scmp.lt.s32.totalorder %s5458_s9, 1 }
  0x35   : > { %5340 = vsyncadd (%p5904_p1), [#allocation4], 4294964096  ;;  %s5012_s20 = sshll.u32 %s311_s23, 4  ;;  %p5905_p6 = scmp.ne.s32.totalorder %s5458_s9, 0 }
  0x36   : > { %s315_s24 = scalar_select %p314_p5, %s5458_s9, 1 }
  0x37   : > { %s5531_s10 = scalar_lea.vmem [#allocation6], %s5012_s20  ;;  %322 = sbr.rel (%p5905_p6) target bundleno = 62 (0x3e), region = 60  ;;  %v5364_v0 = vmov (!%p5905_p6), 0.0  }
  0x38   : > { %s5079_s25 = sshll.u32 %s315_s24, 4  ;;  %323 = vst [vmem:[#allocation2] sm:$0xff] (!%p5905_p6), %v5364_v0  ;;  %324 = vst [vmem:[#allocation2 + $0x8] sm:$0xff] (!%p5905_p6), %v5364_v0 }
  0x39   : > { %s5529_s17 = scalar_lea.vmem %s5887_s1, %s5079_s25  ;;  %325 = vst [vmem:[#allocation2 + $0x10] sm:$0xff] (!%p5905_p6), %v5364_v0  ;;  %326 = vst [vmem:[#allocation2 + $0x18] sm:$0xff] (!%p5905_p6), %v5364_v0 }
  0x3a   : > { %327 = vst [vmem:[#allocation2 + $0x20] sm:$0xff] (!%p5905_p6), %v5364_v0 }
  0x3e PF: > { %v330_v1 = vld [vmem:[%s5529_s17] sm:$0xff]  ;;  %vm347_vm0 = vcmask 1043456   ;;  %v331_v2 = vld [vmem:[%s5529_s17 + $0x8] sm:$0xff]  ;;  %v5365_v5 = vmov 0.0   ;;  %vm343_vm1 = vcmask 31744   ;;  %v5366_v7 = vmov 0  }
  0x3f   : > { %v341_v3 = vcombine.high %v330_v1, %v330_v1  ;;  %v342_v4 = vcombine.high %v331_v2, %v331_v2  ;;  %420 = vmatprep.mubr.f32.mxu0 %v5365_v5  ;;  %491 = vmatprep.mubr.f32.mxu1 %v5365_v5  ;;  %v332_v6 = vld [vmem:[%s5888_s2] sm:$0xff]  ;;  %s5367_s22 = smov 41   ;;  %v512_v10 = vlaneseq  ;;  %vm539_vm6 = vcmask 130048   ;;  %s5368_s25 = smov 42   ;;  %v547_v50 = vld [vmem:[#allocation3 + $0x8] sm:$0xff]  ;;  %v545_v58 = vld [vmem:[#allocation3] sm:$0xff] }
  0x40   : > { %5256 = vset.pattern.permute.xlu0 %v5366_v7  ;;  %5257 = vset.pattern.permute.xlu1 %v5366_v7  ;;  %v333_v8 = vld [vmem:[%s5889_s3] sm:$0xff]  ;;  %s5369_s19 = smov 40   ;;  %s5370_s26 = smov 39   ;;  %vm560_vm7 = vcmask 334848   ;;  %vm568_vm8 = vcmask 64512   ;;  %vm722_vm9 = vcmask 343040  }
  0x41   : > { %5016 = vmatprep.subr.msk.mxu0 %vm347_vm0, %v341_v3  ;;  %5019 = vmatprep.subr.msk.mxu1 %vm347_vm0, %v342_v4  ;;  %v5551_v9 = vld [vmem:[#allocation2] sm:$0xff]  ;;  %v513_v11 = vshrl.u32 %v512_v10, 7  ;;  %s5371_s12 = smov 38   ;;  %s5372_s13 = smov 22   ;;  %vm885_vm10 = vcmask 326656   ;;  %vm1052_vm11 = vcmask 318464  }
  0x42   : > { %5017 = vmatpush1.msk.msra.mxu0 %vm347_vm0, %v330_v1  ;;  %5020 = vmatpush1.msk.msra.mxu1 %vm347_vm0, %v331_v2  ;;  %v510_v15 = vld [vmem:[%s5886_s0] sm:$0xf]  ;;  %s5373_s18 = smov 21   ;;  %s5374_s21 = smov 20   ;;  %vm1219_vm12 = vcmask 310272   ;;  %vm1386_vm13 = vcmask 179200  }
  0x43   : > { %5018 = vmatmul.mubr.msk.f32.vlgmr.msra.gmra.mrb[0].mxu0 %vm343_vm1, %v332_v6  ;;  %5021 = vmatmul.mubr.msk.f32.vlgmr.msra.gmra.mrb[0].mxu1 %vm343_vm1, %v332_v6  ;;  %v514_v12 = vsub.s32 0, %v513_v11  ;;  %v522_v13 = vsub.s32 2, %v513_v11  ;;  %v518_v16 = vsub.s32 1, %v513_v11  ;;  %v526_v17 = vsub.s32 3, %v513_v11  ;;  %s5376_s20 = smov 18   ;;  %s5377_s24 = smov 2  }
  0x44   : > { %336 = vperm.xlu0 %5256, %v333_v8   ;;  %707 = vmatprep.mubr.f32.mxu1 %v5365_v5  ;;  %v876_v2 = vld [vmem:[#allocation3 + $0x10] sm:$0xff]  ;;  %v1043_v11 = vld [vmem:[#allocation3 + $0x18] sm:$0xff]  ;;  %vm1553_vm14 = vcmask 171008   ;;  %vm1720_vm15 = vcmask 162816   ;;  %vm1887_vm1 = vcmask 154624   ;;  %p5906_p10 = scmp.ne.s32.totalorder %s5898_s15, 0 }
  0x45   : > { %636 = vmatprep.mubr.f32.mxu0 %v5365_v5  ;;  %552 = vrot.lane.b32.xlu1 %v5551_v9, %s5367_s22  ;;  %v515_v21 = vrot.slane %v510_v15, %v514_v12  ;;  %v523_v23 = vrot.slane %v510_v15, %v522_v13  ;;  %v519_v27 = vrot.slane %v510_v15, %v518_v16 }
  0x46   : > { %v527_v29 = vrot.slane %v510_v15, %v526_v17 }
  0xb7   : > { %v553_v43 = vpop.permute.xlu1 %552 }
  0xc3   : > { %v337_v14 = vpop.permute.xlu0 %336 }
 0x116   : > { %v422_v18 = vpop.f32.mrb[0].mxu0  ;;  %v493_v19 = vpop.f32.mrb[0].mxu1 }
 0x117   : > { %v423_v20 = vadd.f32 %v422_v18, %v337_v14  ;;  %v494_v22 = vadd.f32 %v493_v19, %v337_v14  ;;  %v424_v24 = vpop.f32.mrb[1].mxu0  ;;  %v495_v25 = vpop.f32.mrb[1].mxu1  ;;  %v1210_v19 = vld [vmem:[#allocation3 + $0x20] sm:$0xff] }
 0x118   : > { %v425_v26 = vadd.f32 %v424_v24, %v337_v14  ;;  %v496_v28 = vadd.f32 %v495_v25, %v337_v14 }
 0x119   : > { %vm498_vm2 = vcmp.gt.f32.partialorder %v423_v20, 0.0  ;;  %v502_v30 = vmul.f32 0.01, %v423_v20  ;;  %vm500_vm3 = vcmp.gt.f32.partialorder %v494_v22, 0.0  ;;  %v504_v31 = vmul.f32 0.01, %v494_v22 }
 0x11a   : > { %vm499_vm4 = vcmp.gt.f32.partialorder %v425_v26, 0.0  ;;  %v503_v32 = vmul.f32 0.01, %v425_v26  ;;  %vm501_vm5 = vcmp.gt.f32.partialorder %v496_v28, 0.0  ;;  %v505_v33 = vmul.f32 0.01, %v496_v28 }
 0x11b   : > { %v506_v34 = vsel %vm498_vm2, %v423_v20, %v502_v30  ;;  %v508_v35 = vsel %vm500_vm3, %v494_v22, %v504_v31  ;;  %vm2054_vm2 = vcmask 146432   ;;  %vm2233_vm3 = vcmask 15360  }
 0x11c   : > { %v5558_v36 = vmul.f32 %v515_v21, %v506_v34  ;;  %v5560_v37 = vmul.f32 %v523_v23, %v508_v35  ;;  %v507_v38 = vsel %vm499_vm4, %v425_v26, %v503_v32  ;;  %v509_v39 = vsel %vm501_vm5, %v496_v28, %v505_v33  ;;  %v1544_v35 = vld [vmem:[#allocation3 + $0x30] sm:$0xff] }
 0x11d   : > { %v5562_v40 = vmul.f32 %v519_v27, %v507_v38  ;;  %v5564_v41 = vmul.f32 %v527_v29, %v509_v39  ;;  %v1377_v27 = vld [vmem:[#allocation3 + $0x28] sm:$0xff]  ;;  %vm2403_vm4 = vcmask 7168   ;;  %vm2722_vm5 = vcmask 1039360  }
 0x11e   : > { %536 = vst [vmem:[#allocation2 + $0x8] sm:$0xff] %v5558_v36  ;;  %538 = vst [vmem:[#allocation2 + $0x18] sm:$0xff] %v5560_v37  ;;  %716 = vrot.lane.b32.xlu1 %v5558_v36, %s5368_s25  ;;  %554 = vrot.lane.b32.xlu0 %v5558_v36, %s5367_s22 }
 0x11f   : > { %537 = vst [vmem:[#allocation2 + $0x10] sm:$0xff] %v5562_v40  ;;  %540 = vst.msk [vmem:[#allocation2 + $0x20] sm:$0xff] %vm539_vm6, %v5564_v41  ;;  %vm2889_vm6 = vcmask 1031168  }
 0x122   : > { %556 = vrot.lane.b32.xlu1 %v5562_v40, %s5367_s22  ;;  %558 = vrot.lane.b32.xlu0 %v5560_v37, %s5367_s22  ;;  %s5375_s22 = smov 19  }
 0x126   : > { %714 = vrot.lane.b32.xlu1 %v5551_v9, %s5368_s25  ;;  %720 = vrot.lane.b32.xlu0 %v5560_v37, %s5368_s25  ;;  %v5615_v42 = vld [vmem:[#allocation2 + $0x20] sm:$0xff] }
 0x12a   : > { %879 = vrot.lane.b32.xlu1 %v5558_v36, %s5369_s19  ;;  %718 = vrot.lane.b32.xlu0 %v5562_v40, %s5368_s25  ;;  %s5378_s25 = smov 1  }
 0x12e   : > { %877 = vrot.lane.b32.xlu1 %v5551_v9, %s5369_s19  ;;  %883 = vrot.lane.b32.xlu0 %v5560_v37, %s5369_s19 }
 0x132   : > { %1046 = vrot.lane.b32.xlu1 %v5558_v36, %s5370_s26  ;;  %881 = vrot.lane.b32.xlu0 %v5562_v40, %s5369_s19  ;;  %s5379_s19 = smov 127  }
 0x136   : > { %1044 = vrot.lane.b32.xlu1 %v5551_v9, %s5370_s26  ;;  %1050 = vrot.lane.b32.xlu0 %v5560_v37, %s5370_s26 }
 0x13a   : > { %1213 = vrot.lane.b32.xlu1 %v5558_v36, %s5371_s12  ;;  %1048 = vrot.lane.b32.xlu0 %v5562_v40, %s5370_s26  ;;  %s5380_s26 = smov 126  }
 0x13e   : > { %1211 = vrot.lane.b32.xlu1 %v5551_v9, %s5371_s12  ;;  %1217 = vrot.lane.b32.xlu0 %v5560_v37, %s5371_s12 }
 0x142   : > { %1380 = vrot.lane.b32.xlu1 %v5558_v36, %s5372_s13  ;;  %1215 = vrot.lane.b32.xlu0 %v5562_v40, %s5371_s12  ;;  %s5381_s12 = smov 110  }
 0x146   : > { %1378 = vrot.lane.b32.xlu1 %v5551_v9, %s5372_s13  ;;  %1384 = vrot.lane.b32.xlu0 %v5560_v37, %s5372_s13 }
 0x14a   : > { %1547 = vrot.lane.b32.xlu1 %v5558_v36, %s5373_s18  ;;  %1382 = vrot.lane.b32.xlu0 %v5562_v40, %s5372_s13  ;;  %s5382_s13 = smov 109  }
 0x14e   : > { %1545 = vrot.lane.b32.xlu1 %v5551_v9, %s5373_s18  ;;  %1551 = vrot.lane.b32.xlu0 %v5560_v37, %s5373_s18 }
 0x152   : > { %1714 = vrot.lane.b32.xlu1 %v5558_v36, %s5374_s21  ;;  %1549 = vrot.lane.b32.xlu0 %v5562_v40, %s5373_s18  ;;  %s5383_s18 = smov 108  }
 0x156   : > { %1712 = vrot.lane.b32.xlu1 %v5551_v9, %s5374_s21  ;;  %1718 = vrot.lane.b32.xlu0 %v5560_v37, %s5374_s21 }
 0x15a   : > { %1881 = vrot.lane.b32.xlu1 %v5558_v36, %s5375_s22  ;;  %1716 = vrot.lane.b32.xlu0 %v5562_v40, %s5374_s21  ;;  %s5384_s21 = smov 107  }
 0x15e   : > { %1879 = vrot.lane.b32.xlu1 %v5551_v9, %s5375_s22  ;;  %1885 = vrot.lane.b32.xlu0 %v5560_v37, %s5375_s22 }
 0x162   : > { %2048 = vrot.lane.b32.xlu1 %v5558_v36, %s5376_s20  ;;  %1883 = vrot.lane.b32.xlu0 %v5562_v40, %s5375_s22  ;;  %s5385_s22 = smov 106  }
 0x166   : > { %2046 = vrot.lane.b32.xlu1 %v5551_v9, %s5376_s20  ;;  %2052 = vrot.lane.b32.xlu0 %v5560_v37, %s5376_s20 }
 0x16a   : > { %2225 = vrot.lane.b32.xlu1 %v5558_v36, %s5377_s24  ;;  %2050 = vrot.lane.b32.xlu0 %v5562_v40, %s5376_s20  ;;  %s5386_s20 = smov 90  }
 0x16e   : > { %2229 = vrot.lane.b32.xlu1 %v5560_v37, %s5377_s24  ;;  %2227 = vrot.lane.b32.xlu0 %v5562_v40, %s5377_s24 }
 0x172   : > { %2223 = vrot.lane.b32.xlu1 %v5551_v9, %s5377_s24  ;;  %2231 = vrot.lane.b32.xlu0 %v5615_v42, %s5377_s24  ;;  %s5387_s24 = smov 89  }
 0x176   : > { %2397 = vrot.lane.b32.xlu1 %v5562_v40, %s5378_s25  ;;  %2395 = vrot.lane.b32.xlu0 %v5558_v36, %s5378_s25 }
 0x17a   : > { %2401 = vrot.lane.b32.xlu1 %v5615_v42, %s5378_s25  ;;  %2399 = vrot.lane.b32.xlu0 %v5560_v37, %s5378_s25 }
 0x17e   : > { %2716 = vrot.lane.b32.xlu1 %v5562_v40, %s5379_s19  ;;  %2393 = vrot.lane.b32.xlu0 %v5551_v9, %s5378_s25  ;;  %s5388_s25 = smov 88  }
 0x182   : > { %2714 = vrot.lane.b32.xlu1 %v5558_v36, %s5379_s19  ;;  %2718 = vrot.lane.b32.xlu0 %v5560_v37, %s5379_s19 }
 0x186   : > { %2883 = vrot.lane.b32.xlu1 %v5562_v40, %s5380_s26  ;;  %2720 = vrot.lane.b32.xlu0 %v5615_v42, %s5379_s19  ;;  %s5389_s19 = smov 87  }
 0x18a   : > { %2881 = vrot.lane.b32.xlu1 %v5558_v36, %s5380_s26  ;;  %2885 = vrot.lane.b32.xlu0 %v5560_v37, %s5380_s26 }
 0x18e   : > { %3050 = vrot.lane.b32.xlu1 %v5562_v40, %s5381_s12  ;;  %2887 = vrot.lane.b32.xlu0 %v5615_v42, %s5380_s26  ;;  %s5390_s26 = smov 86  }
 0x190   : > { %v717_v44 = vpop.permute.xlu1 %716  ;;  %v555_v45 = vpop.permute.xlu0 %554 }
 0x191   : > { %v561_v51 = vsel %vm560_vm7, %v553_v43, %v555_v45 }
 0x192   : > { %3048 = vrot.lane.b32.xlu1 %v5558_v36, %s5381_s12  ;;  %3052 = vrot.lane.b32.xlu0 %v5560_v37, %s5381_s12 }
 0x194   : > { %v557_v46 = vpop.permute.xlu1 %556  ;;  %v559_v47 = vpop.permute.xlu0 %558 }
 0x195   : > { %v563_v48 = vsel %vm560_vm7, %v557_v46, %v559_v47  ;;  %643 = vmatprep.subr.mxu1 %v559_v47  ;;  %v562_v49 = vsel %vm560_vm7, %v555_v45, %v557_v46  ;;  %vm3056_vm7 = vcmask 900096  }
 0x196   : > { %3217 = vrot.lane.b32.xlu1 %v5562_v40, %s5382_s13  ;;  %3054 = vrot.lane.b32.xlu0 %v5615_v42, %s5381_s12 }
 0x197   : > { %572 = vmatprep.subr.mxu0 %v562_v49  ;;  %644 = vmatpush1.msra.mxu1 %v563_v48  ;;  %v1711_v48 = vld [vmem:[#allocation3 + $0x38] sm:$0xff] }
 0x198   : > { %573 = vmatpush1.msra.mxu0 %v561_v51  ;;  %v715_v52 = vpop.permute.xlu1 %714  ;;  %5023 = vmatmul.mubr.msk.f32.vlgmr.msra.gmra.mrb[2].mxu1 %vm568_vm8, %v547_v50  ;;  %v721_v53 = vpop.permute.xlu0 %720 }
 0x199   : > { %804 = vmatprep.subr.mxu1 %v721_v53  ;;  %5022 = vmatmul.mubr.msk.f32.vlgmr.msra.gmra.mrb[2].mxu0 %vm568_vm8, %v547_v50  ;;  %v723_v59 = vsel %vm722_vm9, %v715_v52, %v717_v44 }
 0x19a   : > { %3215 = vrot.lane.b32.xlu1 %v5558_v36, %s5382_s13  ;;  %3219 = vrot.lane.b32.xlu0 %v5560_v37, %s5382_s13 }
 0x19b   : > { %868 = vmatprep.mubr.f32.mxu1 %v5365_v5  ;;  %797 = vmatprep.mubr.f32.mxu0 %v5365_v5 }
 0x19c   : > { %v880_v54 = vpop.permute.xlu1 %879  ;;  %v719_v55 = vpop.permute.xlu0 %718 }
 0x19d   : > { %v725_v56 = vsel %vm722_vm9, %v719_v55, %v721_v53  ;;  %v724_v57 = vsel %vm722_vm9, %v717_v44, %v719_v55  ;;  %vm3223_vm9 = vcmask 891904  }
 0x19e   : > { %3384 = vrot.lane.b32.xlu1 %v5562_v40, %s5383_s18  ;;  %3221 = vrot.lane.b32.xlu0 %v5615_v42, %s5382_s13  ;;  %s4921_s13 = scalar_lea.sflag [#allocation5], %s311_s23 }
 0x19f   : > { %733 = vmatprep.subr.mxu0 %v724_v57  ;;  %805 = vmatpush1.msra.mxu1 %v725_v56  ;;  %v1878_v56 = vld [vmem:[#allocation3 + $0x40] sm:$0xff] }
 0x1a0   : > { %734 = vmatpush1.msra.mxu0 %v723_v59  ;;  %v878_v60 = vpop.permute.xlu1 %877  ;;  %5025 = vmatmul.mubr.msk.f32.vlgmr.msra.gmra.mrb[2].mxu1 %vm568_vm8, %v545_v58  ;;  %v884_v61 = vpop.permute.xlu0 %883 }
 0x1a1   : > { %967 = vmatprep.subr.mxu1 %v884_v61  ;;  %5024 = vmatmul.mubr.msk.f32.vlgmr.msra.gmra.mrb[2].mxu0 %vm568_vm8, %v545_v58  ;;  %v886_v3 = vsel %vm885_vm10, %v878_v60, %v880_v54 }
 0x1a2   : > { %3382 = vrot.lane.b32.xlu1 %v5558_v36, %s5383_s18  ;;  %3386 = vrot.lane.b32.xlu0 %v5560_v37, %s5383_s18 }
 0x1a3   : > { %1031 = vmatprep.mubr.f32.mxu1 %v5365_v5  ;;  %960 = vmatprep.mubr.f32.mxu0 %v5365_v5 }
 0x1a4   : > { %v1047_v62 = vpop.permute.xlu1 %1046  ;;  %v882_v63 = vpop.permute.xlu0 %881 }
 0x1a5   : > { %v888_v0 = vsel %vm885_vm10, %v882_v63, %v884_v61  ;;  %v887_v1 = vsel %vm885_vm10, %v880_v54, %v882_v63  ;;  %vm3390_vm10 = vcmask 883712  }
 0x1a6   : > { %3551 = vrot.lane.b32.xlu1 %v5562_v40, %s5384_s21  ;;  %3388 = vrot.lane.b32.xlu0 %v5615_v42, %s5383_s18 }
 0x1a7   : > { %896 = vmatprep.subr.mxu0 %v887_v1  ;;  %968 = vmatpush1.msra.mxu1 %v888_v0  ;;  %v2045_v0 = vld [vmem:[#allocation3 + $0x48] sm:$0xff] }
 0x1a8   : > { %897 = vmatpush1.msra.mxu0 %v886_v3  ;;  %v1045_v4 = vpop.permute.xlu1 %1044  ;;  %5027 = vmatmul.mubr.msk.f32.vlgmr.msra.gmra.mrb[2].mxu1 %vm568_vm8, %v876_v2  ;;  %v1051_v6 = vpop.permute.xlu0 %1050 }
 0x1a9   : > { %1134 = vmatprep.subr.mxu1 %v1051_v6  ;;  %5026 = vmatmul.mubr.msk.f32.vlgmr.msra.gmra.mrb[2].mxu0 %vm568_vm8, %v876_v2  ;;  %v1053_v12 = vsel %vm1052_vm11, %v1045_v4, %v1047_v62  ;;  %v4743_v2 = vld [vmem:[%s5893_s7] sm:$0xf] }
 0x1aa   : > { %3549 = vrot.lane.b32.xlu1 %v5558_v36, %s5384_s21  ;;  %3553 = vrot.lane.b32.xlu0 %v5560_v37, %s5384_s21 }
 0x1ab   : > { %1198 = vmatprep.mubr.f32.mxu1 %v5365_v5  ;;  %1127 = vmatprep.mubr.f32.mxu0 %v5365_v5 }
 0x1ac   : > { %v1214_v7 = vpop.permute.xlu1 %1213  ;;  %v1049_v8 = vpop.permute.xlu0 %1048 }
 0x1ad   : > { %v1055_v9 = vsel %vm1052_vm11, %v1049_v8, %v1051_v6  ;;  %v1054_v10 = vsel %vm1052_vm11, %v1047_v62, %v1049_v8  ;;  %vm3557_vm11 = vcmask 875520  }
 0x1ae   : > { %3718 = vrot.lane.b32.xlu1 %v5562_v40, %s5385_s22  ;;  %3555 = vrot.lane.b32.xlu0 %v5615_v42, %s5384_s21 }
 0x1af   : > { %1063 = vmatprep.subr.mxu0 %v1054_v10  ;;  %1135 = vmatpush1.msra.mxu1 %v1055_v9 }
 0x1b0   : > { %1064 = vmatpush1.msra.mxu0 %v1053_v12  ;;  %v1212_v13 = vpop.permute.xlu1 %1211  ;;  %5029 = vmatmul.mubr.msk.f32.vlgmr.msra.gmra.mrb[2].mxu1 %vm568_vm8, %v1043_v11  ;;  %v1218_v14 = vpop.permute.xlu0 %1217  ;;  %v2217_v12 = vld [vmem:[#allocation3 + $0x50] sm:$0xff] }
 0x1b1   : > { %1301 = vmatprep.subr.mxu1 %v1218_v14  ;;  %5028 = vmatmul.mubr.msk.f32.vlgmr.msra.gmra.mrb[2].mxu0 %vm568_vm8, %v1043_v11  ;;  %v1220_v20 = vsel %vm1219_vm12, %v1212_v13, %v1214_v7 }
 0x1b2   : > { %3716 = vrot.lane.b32.xlu1 %v5558_v36, %s5385_s22  ;;  %3720 = vrot.lane.b32.xlu0 %v5560_v37, %s5385_s22 }
 0x1b3   : > { %1365 = vmatprep.mubr.f32.mxu1 %v5365_v5  ;;  %1294 = vmatprep.mubr.f32.mxu0 %v5365_v5 }
 0x1b4   : > { %v1381_v15 = vpop.permute.xlu1 %1380  ;;  %v1216_v16 = vpop.permute.xlu0 %1215 }
 0x1b5   : > { %v1222_v17 = vsel %vm1219_vm12, %v1216_v16, %v1218_v14  ;;  %v1221_v18 = vsel %vm1219_vm12, %v1214_v7, %v1216_v16  ;;  %v4716_v7 = vld [vmem:[%s5891_s5] sm:$0xff]  ;;  %vm3724_vm12 = vcmask 867328  }
 0x1b6   : > { %3885 = vrot.lane.b32.xlu1 %v5562_v40, %s5386_s20  ;;  %3722 = vrot.lane.b32.xlu0 %v5615_v42, %s5385_s22 }
 0x1b7   : > { %1230 = vmatprep.subr.mxu0 %v1221_v18  ;;  %1302 = vmatpush1.msra.mxu1 %v1222_v17 }
 0x1b8   : > { %1231 = vmatpush1.msra.mxu0 %v1220_v20  ;;  %v1379_v21 = vpop.permute.xlu1 %1378  ;;  %5031 = vmatmul.mubr.msk.f32.vlgmr.msra.gmra.mrb[2].mxu1 %vm568_vm8, %v1210_v19  ;;  %v1385_v22 = vpop.permute.xlu0 %1384 }
 0x1b9   : > { %1468 = vmatprep.subr.mxu1 %v1385_v22  ;;  %5030 = vmatmul.mubr.msk.f32.vlgmr.msra.gmra.mrb[2].mxu0 %vm568_vm8, %v1210_v19  ;;  %v1387_v28 = vsel %vm1386_vm13, %v1379_v21, %v1381_v15  ;;  %v2392_v21 = vld [vmem:[#allocation3 + $0x58] sm:$0xff] }
 0x1ba   : > { %3883 = vrot.lane.b32.xlu1 %v5558_v36, %s5386_s20  ;;  %3887 = vrot.lane.b32.xlu0 %v5560_v37, %s5386_s20 }
 0x1bb   : > { %1532 = vmatprep.mubr.f32.mxu1 %v5365_v5  ;;  %1461 = vmatprep.mubr.f32.mxu0 %v5365_v5 }
 0x1bc   : > { %v1548_v23 = vpop.permute.xlu1 %1547  ;;  %v1383_v24 = vpop.permute.xlu0 %1382 }
 0x1bd   : > { %v1389_v25 = vsel %vm1386_vm13, %v1383_v24, %v1385_v22  ;;  %v1388_v26 = vsel %vm1386_vm13, %v1381_v15, %v1383_v24  ;;  %vm3891_vm13 = vcmask 736256  }
 0x1be   : > { %4052 = vrot.lane.b32.xlu1 %v5562_v40, %s5387_s24  ;;  %3889 = vrot.lane.b32.xlu0 %v5615_v42, %s5386_s20 }
 0x1bf   : > { %1397 = vmatprep.subr.mxu0 %v1388_v26  ;;  %1469 = vmatpush1.msra.mxu1 %v1389_v25 }
 0x1c0   : > { %1398 = vmatpush1.msra.mxu0 %v1387_v28  ;;  %v1546_v29 = vpop.permute.xlu1 %1545  ;;  %5033 = vmatmul.mubr.msk.f32.vlgmr.msra.gmra.mrb[2].mxu1 %vm568_vm8, %v1377_v27  ;;  %v1552_v30 = vpop.permute.xlu0 %1551 }
 0x1c1   : > { %1635 = vmatprep.subr.mxu1 %v1552_v30  ;;  %5032 = vmatmul.mubr.msk.f32.vlgmr.msra.gmra.mrb[2].mxu0 %vm568_vm8, %v1377_v27  ;;  %v1554_v38 = vsel %vm1553_vm14, %v1546_v29, %v1548_v23  ;;  %v2562_v27 = vld [vmem:[#allocation3 + $0x60] sm:$0xff] }
 0x1c2   : > { %4050 = vrot.lane.b32.xlu1 %v5558_v36, %s5387_s24  ;;  %4054 = vrot.lane.b32.xlu0 %v5560_v37, %s5387_s24 }
 0x1c3   : > { %1699 = vmatprep.mubr.f32.mxu1 %v5365_v5  ;;  %1628 = vmatprep.mubr.f32.mxu0 %v5365_v5 }
 0x1c4   : > { %v1715_v31 = vpop.permute.xlu1 %1714  ;;  %v1550_v32 = vpop.permute.xlu0 %1549 }
 0x1c5   : > { %v1556_v33 = vsel %vm1553_vm14, %v1550_v32, %v1552_v30  ;;  %v1555_v34 = vsel %vm1553_vm14, %v1548_v23, %v1550_v32  ;;  %v2713_v32 = vld [vmem:[#allocation3 + $0x68] sm:$0xff]  ;;  %vm4058_vm14 = vcmask 728064  }
 0x1c6   : > { %4219 = vrot.lane.b32.xlu1 %v5562_v40, %s5388_s25  ;;  %4056 = vrot.lane.b32.xlu0 %v5615_v42, %s5387_s24  ;;  %s5080_s24 = sshll.u32 %s5458_s9, 8  ;;  %s5391_s9 = smov [#allocation6]  }
 0x1c7   : > { %1564 = vmatprep.subr.mxu0 %v1555_v34  ;;  %1636 = vmatpush1.msra.mxu1 %v1556_v33  ;;  %s5841_s12 = scalar_lea.hbm %s5894_s8, %s5080_s24 }
 0x1c8   : > { %1565 = vmatpush1.msra.mxu0 %v1554_v38  ;;  %v1713_v39 = vpop.permute.xlu1 %1712  ;;  %5035 = vmatmul.mubr.msk.f32.vlgmr.msra.gmra.mrb[2].mxu1 %vm568_vm8, %v1544_v35  ;;  %v1719_v43 = vpop.permute.xlu0 %1718 }
 0x1c9   : > { %1802 = vmatprep.subr.mxu1 %v1719_v43  ;;  %5034 = vmatmul.mubr.msk.f32.vlgmr.msra.gmra.mrb[2].mxu0 %vm568_vm8, %v1544_v35  ;;  %v1721_v49 = vsel %vm1720_vm15, %v1713_v39, %v1715_v31 }
 0x1ca   : > { %4217 = vrot.lane.b32.xlu1 %v5558_v36, %s5388_s25  ;;  %4221 = vrot.lane.b32.xlu0 %v5560_v37, %s5388_s25 }
 0x1cb   : > { %1866 = vmatprep.mubr.f32.mxu1 %v5365_v5  ;;  %1795 = vmatprep.mubr.f32.mxu0 %v5365_v5 }
 0x1cc   : > { %v1882_v44 = vpop.permute.xlu1 %1881  ;;  %v1717_v45 = vpop.permute.xlu0 %1716 }
 0x1cd   : > { %v1723_v46 = vsel %vm1720_vm15, %v1717_v45, %v1719_v43  ;;  %v1722_v47 = vsel %vm1720_vm15, %v1715_v31, %v1717_v45  ;;  %v2880_v45 = vld [vmem:[#allocation3 + $0x70] sm:$0xff]  ;;  %vm4225_vm15 = vcmask 719872  }
 0x1ce   : > { %4386 = vrot.lane.b32.xlu1 %v5562_v40, %s5389_s19  ;;  %4223 = vrot.lane.b32.xlu0 %v5615_v42, %s5388_s25  ;;  %s4935_s25 = sshll.u32 %s5531_s10, 4  ;;  %s5843_s25 = int_to_ptr.vmem [resolvable:$true] %s4935_s25 }
 0x1cf   : > { %1731 = vmatprep.subr.mxu0 %v1722_v47  ;;  %1803 = vmatpush1.msra.mxu1 %v1723_v46  ;;  %s5293_s18 = scalar_lea.vmem %s5843_s25, 256 }
 0x1d0   : > { %1732 = vmatpush1.msra.mxu0 %v1721_v49  ;;  %v1880_v50 = vpop.permute.xlu1 %1879  ;;  %5037 = vmatmul.mubr.msk.f32.vlgmr.msra.gmra.mrb[2].mxu1 %vm568_vm8, %v1711_v48  ;;  %v1886_v51 = vpop.permute.xlu0 %1885  ;;  %p5294_p9 = scmp.ne.s32.totalorder %s5843_s25, %s5293_s18 }
 0x1d1   : > { %1969 = vmatprep.subr.mxu1 %v1886_v51  ;;  %5036 = vmatmul.mubr.msk.f32.vlgmr.msra.gmra.mrb[2].mxu0 %vm568_vm8, %v1711_v48  ;;  %v1888_v57 = vsel %vm1887_vm1, %v1880_v50, %v1882_v44 }
 0x1d2   : > { %4384 = vrot.lane.b32.xlu1 %v5558_v36, %s5389_s19  ;;  %4388 = vrot.lane.b32.xlu0 %v5560_v37, %s5389_s19  ;;  %p5295_p11 = pnand %p5294_p9, %p5906_p10 }
 0x1d3   : > { %2033 = vmatprep.mubr.f32.mxu1 %v5365_v5  ;;  %1962 = vmatprep.mubr.f32.mxu0 %v5365_v5 }
 0x1d4   : > { %v2049_v52 = vpop.permute.xlu1 %2048  ;;  %v1884_v53 = vpop.permute.xlu0 %1883  ;;  %p5296_p13 = pneg %p5295_p11 }
 0x1d5   : > { %v1890_v54 = vsel %vm1887_vm1, %v1884_v53, %v1886_v51  ;;  %v1889_v55 = vsel %vm1887_vm1, %v1882_v44, %v1884_v53  ;;  %v3047_v53 = vld [vmem:[#allocation3 + $0x78] sm:$0xff]  ;;  %vm4392_vm1 = vcmask 711680  }
 0x1d6   : > { %4553 = vrot.lane.b32.xlu1 %v5562_v40, %s5390_s26  ;;  %4390 = vrot.lane.b32.xlu0 %v5615_v42, %s5389_s19 }
 0x1d7   : > { %1898 = vmatprep.subr.mxu0 %v1889_v55  ;;  %1970 = vmatpush1.msra.mxu1 %v1890_v54 }
 0x1d8   : > { %1899 = vmatpush1.msra.mxu0 %v1888_v57  ;;  %v2047_v58 = vpop.permute.xlu1 %2046  ;;  %5039 = vmatmul.mubr.msk.f32.vlgmr.msra.gmra.mrb[2].mxu1 %vm568_vm8, %v1878_v56  ;;  %v2053_v59 = vpop.permute.xlu0 %2052 }
 0x1d9   : > { %2136 = vmatprep.subr.mxu1 %v2053_v59  ;;  %5038 = vmatmul.mubr.msk.f32.vlgmr.msra.gmra.mrb[2].mxu0 %vm568_vm8, %v1878_v56  ;;  %v2055_v1 = vsel %vm2054_vm2, %v2047_v58, %v2049_v52 }
 0x1da   : > { %4551 = vrot.lane.b32.xlu1 %v5558_v36, %s5390_s26  ;;  %4555 = vrot.lane.b32.xlu0 %v5560_v37, %s5390_s26 }
 0x1db   : > { %2200 = vmatprep.mubr.f32.mxu1 %v5365_v5  ;;  %2129 = vmatprep.mubr.f32.mxu0 %v5365_v5 }
 0x1dc   : > { %v2226_v60 = vpop.permute.xlu1 %2225  ;;  %v2051_v61 = vpop.permute.xlu0 %2050 }
 0x1dd   : > { %v2057_v62 = vsel %vm2054_vm2, %v2051_v61, %v2053_v59  ;;  %v2056_v63 = vsel %vm2054_vm2, %v2049_v52, %v2051_v61  ;;  %v3214_v61 = vld [vmem:[#allocation3 + $0x80] sm:$0xff]  ;;  %vm4559_vm2 = vcmask 703488  }
 0x1de   : > { %4557 = vrot.lane.b32.xlu0 %v5615_v42, %s5390_s26  ;;  %2065 = vmatprep.subr.mxu0 %v2056_v63 }
 0x1df   : > { %2137 = vmatpush1.msra.mxu1 %v2057_v62  ;;  %2066 = vmatpush1.msra.mxu0 %v2055_v1 }
 0x1e0   : > { %v2230_v3 = vpop.permute.xlu1 %2229  ;;  %5041 = vmatmul.mubr.msk.f32.vlgmr.msra.gmra.mrb[2].mxu1 %vm568_vm8, %v2045_v0  ;;  %v2228_v4 = vpop.permute.xlu0 %2227  ;;  %4719 = vperm.xlu1 %5257, %v4716_v7  }
 0x1e1   : > { %v2235_v6 = vsel %vm2233_vm3, %v2226_v60, %v2228_v4  ;;  %5040 = vmatmul.mubr.msk.f32.vlgmr.msra.gmra.mrb[2].mxu0 %vm568_vm8, %v2045_v0  ;;  %2380 = vmatprep.mubr.f32.mxu1 %v5365_v5  ;;  %v2236_v13 = vsel %vm2233_vm3, %v2228_v4, %v2230_v3 }
 0x1e2   : > { %4746 = vperm.xlu0 %5256, %v4743_v2   ;;  %2245 = vmatprep.subr.mxu0 %v2235_v6  ;;  %v3381_v6 = vld [vmem:[#allocation3 + $0x88] sm:$0xff] }
 0x1e3   : > { %2309 = vmatprep.mubr.f32.mxu0 %v5365_v5 }
 0x1e4   : > { %v2224_v8 = vpop.permute.xlu1 %2223  ;;  %v2232_v9 = vpop.permute.xlu0 %2231 }
 0x1e5   : > { %v2234_v10 = vsel %vm2233_vm3, %v2224_v8, %v2226_v60  ;;  %v2237_v11 = vsel %vm2233_vm3, %v2230_v3, %v2232_v9 }
 0x1e6   : > { %2246 = vmatpush1.msra.mxu0 %v2234_v10  ;;  %2316 = vmatprep.subr.mxu1 %v2237_v11 }
 0x1e7   : > { %2317 = vmatpush1.msra.mxu1 %v2236_v13 }
 0x1e8   : > { %v2398_v14 = vpop.permute.xlu1 %2397  ;;  %5043 = vmatmul.mubr.msk.f32.vlgmr.msra.gmra.mrb[2].mxu1 %vm568_vm8, %v2217_v12  ;;  %v2396_v15 = vpop.permute.xlu0 %2395 }
 0x1e9   : > { %v2405_v16 = vsel %vm2403_vm4, %v2396_v15, %v2398_v14  ;;  %5042 = vmatmul.mubr.msk.f32.vlgmr.msra.gmra.mrb[2].mxu0 %vm568_vm8, %v2217_v12  ;;  %2550 = vmatprep.mubr.f32.mxu1 %v5365_v5 }
 0x1ea   : > { %2415 = vmatprep.subr.mxu0 %v2405_v16  ;;  %2479 = vmatprep.mubr.f32.mxu0 %v5365_v5 }
 0x1ec   : > { %v2402_v17 = vpop.permute.xlu1 %2401  ;;  %v2400_v18 = vpop.permute.xlu0 %2399 }
 0x1ed   : > { %v2406_v19 = vsel %vm2403_vm4, %v2398_v14, %v2400_v18  ;;  %v2407_v20 = vsel %vm2403_vm4, %v2400_v18, %v2402_v17  ;;  %v3548_v14 = vld [vmem:[#allocation3 + $0x90] sm:$0xff] }
 0x1ee   : > { %2486 = vmatprep.subr.mxu1 %v2407_v20 }
 0x1ef   : > { %2487 = vmatpush1.msra.mxu1 %v2406_v19 }
 0x1f0   : > { %v2717_v22 = vpop.permute.xlu1 %2716  ;;  %5045 = vmatmul.mubr.msk.f32.vlgmr.msra.gmra.mrb[2].mxu1 %vm568_vm8, %v2392_v21  ;;  %2637 = vmatprep.subr.mxu1 %v5615_v42  ;;  %v2394_v23 = vpop.permute.xlu0 %2393 }
 0x1f1   : > { %v2404_v24 = vsel %vm2403_vm4, %v2394_v23, %v2396_v15  ;;  %2638 = vmatpush1.msra.mxu1 %v5560_v37  ;;  %2701 = vmatprep.mubr.f32.mxu1 %v5365_v5 }
 0x1f2   : > { %2416 = vmatpush1.msra.mxu0 %v2404_v24 }
 0x1f3   : > { %5044 = vmatmul.mubr.msk.f32.vlgmr.msra.gmra.mrb[2].mxu0 %vm568_vm8, %v2392_v21  ;;  %2566 = vmatprep.subr.mxu0 %v5562_v40 }
 0x1f4   : > { %v2715_v25 = vpop.permute.xlu1 %2714  ;;  %2567 = vmatpush1.msra.mxu0 %v5558_v36  ;;  %v2719_v26 = vpop.permute.xlu0 %2718  ;;  %2630 = vmatprep.mubr.f32.mxu0 %v5365_v5 }
 0x1f5   : > { %v2724_v42 = vsel %vm2722_vm5, %v2717_v22, %v2719_v26  ;;  %v2723_v36 = vsel %vm2722_vm5, %v2715_v25, %v2717_v22  ;;  %v3715_v22 = vld [vmem:[#allocation3 + $0x98] sm:$0xff] }
 0x1f6   : > { %2733 = vmatprep.subr.mxu0 %v2724_v42 }
 0x1f8   : > { %v2884_v28 = vpop.permute.xlu1 %2883  ;;  %5047 = vmatmul.mubr.msk.f32.vlgmr.msra.gmra.mrb[2].mxu1 %vm568_vm8, %v2562_v27  ;;  %v2721_v37 = vpop.permute.xlu0 %2720 }
 0x1f9   : > { %v2725_v29 = vsel %vm2722_vm5, %v2719_v26, %v2721_v37  ;;  %2804 = vmatprep.subr.mxu1 %v2721_v37  ;;  %2868 = vmatprep.mubr.f32.mxu1 %v5365_v5  ;;  %v3882_v37 = vld [vmem:[#allocation3 + $0xa0] sm:$0xff] }
 0x1fa   : > { %2805 = vmatpush1.msra.mxu1 %v2725_v29 }
 0x1fb   : > { %5046 = vmatmul.mubr.msk.f32.vlgmr.msra.gmra.mrb[2].mxu0 %vm568_vm8, %v2562_v27 }
 0x1fc   : > { %2734 = vmatpush1.msra.mxu0 %v2723_v36  ;;  %v2882_v40 = vpop.permute.xlu1 %2881  ;;  %v2886_v30 = vpop.permute.xlu0 %2885  ;;  %2797 = vmatprep.mubr.f32.mxu0 %v5365_v5 }
 0x1fd   : > { %v2891_v31 = vsel %vm2889_vm6, %v2884_v28, %v2886_v30  ;;  %v2890_v38 = vsel %vm2889_vm6, %v2882_v40, %v2884_v28 }
 0x1fe   : > { %2900 = vmatprep.subr.mxu0 %v2891_v31 }
 0x200   : > { %v3051_v33 = vpop.permute.xlu1 %3050  ;;  %5049 = vmatmul.mubr.msk.f32.vlgmr.msra.gmra.mrb[2].mxu1 %vm568_vm8, %v2713_v32  ;;  %v2888_v34 = vpop.permute.xlu0 %2887 }
 0x201   : > { %v2892_v35 = vsel %vm2889_vm6, %v2886_v30, %v2888_v34  ;;  %2971 = vmatprep.subr.mxu1 %v2888_v34  ;;  %3035 = vmatprep.mubr.f32.mxu1 %v5365_v5  ;;  %v4049_v34 = vld [vmem:[#allocation3 + $0xa8] sm:$0xff] }
 0x202   : > { %2972 = vmatpush1.msra.mxu1 %v2892_v35 }
 0x203   : > { %5048 = vmatmul.mubr.msk.f32.vlgmr.msra.gmra.mrb[2].mxu0 %vm568_vm8, %v2713_v32 }
 0x204   : > { %2901 = vmatpush1.msra.mxu0 %v2890_v38  ;;  %v3049_v39 = vpop.permute.xlu1 %3048  ;;  %v3053_v43 = vpop.permute.xlu0 %3052  ;;  %2964 = vmatprep.mubr.f32.mxu0 %v5365_v5 }
 0x205   : > { %v3058_v44 = vsel %vm3056_vm7, %v3051_v33, %v3053_v43  ;;  %v3057_v49 = vsel %vm3056_vm7, %v3049_v39, %v3051_v33 }
 0x206   : > { %3067 = vmatprep.subr.mxu0 %v3058_v44 }
 0x208   : > { %v3218_v46 = vpop.permute.xlu1 %3217  ;;  %5051 = vmatmul.mubr.msk.f32.vlgmr.msra.gmra.mrb[2].mxu1 %vm568_vm8, %v2880_v45  ;;  %v3055_v47 = vpop.permute.xlu0 %3054 }
 0x209   : > { %v3059_v48 = vsel %vm3056_vm7, %v3053_v43, %v3055_v47  ;;  %3138 = vmatprep.subr.mxu1 %v3055_v47  ;;  %3202 = vmatprep.mubr.f32.mxu1 %v5365_v5  ;;  %v4216_v47 = vld [vmem:[#allocation3 + $0xb0] sm:$0xff] }
 0x20a   : > { %3139 = vmatpush1.msra.mxu1 %v3059_v48 }
 0x20b   : > { %5050 = vmatmul.mubr.msk.f32.vlgmr.msra.gmra.mrb[2].mxu0 %vm568_vm8, %v2880_v45 }
 0x20c   : > { %3068 = vmatpush1.msra.mxu0 %v3057_v49  ;;  %v3216_v50 = vpop.permute.xlu1 %3215  ;;  %v3220_v51 = vpop.permute.xlu0 %3219  ;;  %3131 = vmatprep.mubr.f32.mxu0 %v5365_v5 }
 0x20d   : > { %v3225_v52 = vsel %vm3223_vm9, %v3218_v46, %v3220_v51  ;;  %v3224_v57 = vsel %vm3223_vm9, %v3216_v50, %v3218_v46 }
 0x20e   : > { %3234 = vmatprep.subr.mxu0 %v3225_v52 }
 0x210   : > { %v3385_v54 = vpop.permute.xlu1 %3384  ;;  %5053 = vmatmul.mubr.msk.f32.vlgmr.msra.gmra.mrb[2].mxu1 %vm568_vm8, %v3047_v53  ;;  %v3222_v55 = vpop.permute.xlu0 %3221 }
 0x211   : > { %v3226_v56 = vsel %vm3223_vm9, %v3220_v51, %v3222_v55  ;;  %3305 = vmatprep.subr.mxu1 %v3222_v55  ;;  %3369 = vmatprep.mubr.f32.mxu1 %v5365_v5 }
 0x212   : > { %3306 = vmatpush1.msra.mxu1 %v3226_v56 }
 0x213   : > { %5052 = vmatmul.mubr.msk.f32.vlgmr.msra.gmra.mrb[2].mxu0 %vm568_vm8, %v3047_v53 }
 0x214   : > { %3235 = vmatpush1.msra.mxu0 %v3224_v57  ;;  %v3383_v58 = vpop.permute.xlu1 %3382  ;;  %v3387_v59 = vpop.permute.xlu0 %3386  ;;  %3298 = vmatprep.mubr.f32.mxu0 %v5365_v5 }
 0x215   : > { %v3392_v60 = vsel %vm3390_vm10, %v3385_v54, %v3387_v59  ;;  %v3391_v1 = vsel %vm3390_vm10, %v3383_v58, %v3385_v54  ;;  %v4383_v54 = vld [vmem:[#allocation3 + $0xb8] sm:$0xff] }
 0x216   : > { %3401 = vmatprep.subr.mxu0 %v3392_v60 }
 0x218   : > { %v3552_v62 = vpop.permute.xlu1 %3551  ;;  %5055 = vmatmul.mubr.msk.f32.vlgmr.msra.gmra.mrb[2].mxu1 %vm568_vm8, %v3214_v61  ;;  %v3389_v63 = vpop.permute.xlu0 %3388 }
 0x219   : > { %v3393_v0 = vsel %vm3390_vm10, %v3387_v59, %v3389_v63  ;;  %3472 = vmatprep.subr.mxu1 %v3389_v63  ;;  %3536 = vmatprep.mubr.f32.mxu1 %v5365_v5  ;;  %v4550_v59 = vld [vmem:[#allocation3 + $0xc0] sm:$0xff]  ;;  %vm4917_vm10 = vcmask 130052  }
 0x21a   : > { %3473 = vmatpush1.msra.mxu1 %v3393_v0 }
 0x21b   : > { %5054 = vmatmul.mubr.msk.f32.vlgmr.msra.gmra.mrb[2].mxu0 %vm568_vm8, %v3214_v61 }
 0x21c   : > { %3402 = vmatpush1.msra.mxu0 %v3391_v1  ;;  %v3550_v2 = vpop.permute.xlu1 %3549  ;;  %v3554_v3 = vpop.permute.xlu0 %3553  ;;  %3465 = vmatprep.mubr.f32.mxu0 %v5365_v5 }
 0x21d   : > { %v3559_v4 = vsel %vm3557_vm11, %v3552_v62, %v3554_v3  ;;  %v3558_v10 = vsel %vm3557_vm11, %v3550_v2, %v3552_v62 }
 0x21e   : > { %3568 = vmatprep.subr.mxu0 %v3559_v4 }
 0x220   : > { %v3719_v7 = vpop.permute.xlu1 %3718  ;;  %5057 = vmatmul.mubr.msk.f32.vlgmr.msra.gmra.mrb[2].mxu1 %vm568_vm8, %v3381_v6  ;;  %v3556_v8 = vpop.permute.xlu0 %3555 }
 0x221   : > { %v3560_v9 = vsel %vm3557_vm11, %v3554_v3, %v3556_v8  ;;  %3639 = vmatprep.subr.mxu1 %v3556_v8  ;;  %3703 = vmatprep.mubr.f32.mxu1 %v5365_v5 }
 0x222   : > { %3640 = vmatpush1.msra.mxu1 %v3560_v9 }
 0x223   : > { %5056 = vmatmul.mubr.msk.f32.vlgmr.msra.gmra.mrb[2].mxu0 %vm568_vm8, %v3381_v6 }
 0x224   : > { %3569 = vmatpush1.msra.mxu0 %v3558_v10  ;;  %v3717_v11 = vpop.permute.xlu1 %3716  ;;  %v3721_v12 = vpop.permute.xlu0 %3720  ;;  %3632 = vmatprep.mubr.f32.mxu0 %v5365_v5 }
 0x225   : > { %v3726_v13 = vsel %vm3724_vm12, %v3719_v7, %v3721_v12  ;;  %v3725_v18 = vsel %vm3724_vm12, %v3717_v11, %v3719_v7 }
 0x226   : > { %3735 = vmatprep.subr.mxu0 %v3726_v13 }
 0x228   : > { %v3886_v15 = vpop.permute.xlu1 %3885  ;;  %5059 = vmatmul.mubr.msk.f32.vlgmr.msra.gmra.mrb[2].mxu1 %vm568_vm8, %v3548_v14  ;;  %v3723_v16 = vpop.permute.xlu0 %3722 }
 0x229   : > { %v3727_v17 = vsel %vm3724_vm12, %v3721_v12, %v3723_v16  ;;  %3806 = vmatprep.subr.mxu1 %v3723_v16  ;;  %3870 = vmatprep.mubr.f32.mxu1 %v5365_v5  ;;  %v5260_v12 = vld [vmem:[#allocation2 + $0x18] sm:$0xff]  ;;  %vm4918_vm12 = vmor %vm4917_vm10, %vm347_vm0 }
 0x22a   : > { %3807 = vmatpush1.msra.mxu1 %v3727_v17  ;;  %v5261_v17 = vld [vmem:[#allocation2 + $0x10] sm:$0xff] }
 0x22b   : > { %5058 = vmatmul.mubr.msk.f32.vlgmr.msra.gmra.mrb[2].mxu0 %vm568_vm8, %v3548_v14 }
 0x22c   : > { %3736 = vmatpush1.msra.mxu0 %v3725_v18  ;;  %v3884_v19 = vpop.permute.xlu1 %3883  ;;  %v3888_v20 = vpop.permute.xlu0 %3887  ;;  %3799 = vmatprep.mubr.f32.mxu0 %v5365_v5 }
 0x22d   : > { %v3893_v21 = vsel %vm3891_vm13, %v3886_v15, %v3888_v20  ;;  %v3892_v26 = vsel %vm3891_vm13, %v3884_v19, %v3886_v15  ;;  %v4742_v15 = vld [vmem:[%s5892_s6] sm:$0xf]  ;;  %v5262_v19 = vld [vmem:[#allocation2 + $0x8] sm:$0xff] }
 0x22e   : > { %3902 = vmatprep.subr.mxu0 %v3893_v21 }
 0x230   : > { %v4053_v23 = vpop.permute.xlu1 %4052  ;;  %5061 = vmatmul.mubr.msk.f32.vlgmr.msra.gmra.mrb[2].mxu1 %vm568_vm8, %v3715_v22  ;;  %v3890_v24 = vpop.permute.xlu0 %3889 }
 0x231   : > { %v3894_v25 = vsel %vm3891_vm13, %v3888_v20, %v3890_v24  ;;  %3973 = vmatprep.subr.mxu1 %v3890_v24  ;;  %4037 = vmatprep.mubr.f32.mxu1 %v5365_v5 }
 0x232   : > { %3974 = vmatpush1.msra.mxu1 %v3894_v25 }
 0x233   : > { %5060 = vmatmul.mubr.msk.f32.vlgmr.msra.gmra.mrb[2].mxu0 %vm568_vm8, %v3715_v22 }
 0x234   : > { %3903 = vmatpush1.msra.mxu0 %v3892_v26  ;;  %v4051_v42 = vpop.permute.xlu1 %4050  ;;  %v4055_v27 = vpop.permute.xlu0 %4054  ;;  %3966 = vmatprep.mubr.f32.mxu0 %v5365_v5 }
 0x235   : > { %v4060_v28 = vsel %vm4058_vm14, %v4053_v23, %v4055_v27  ;;  %v4059_v30 = vsel %vm4058_vm14, %v4051_v42, %v4053_v23 }
 0x236   : > { %4069 = vmatprep.subr.mxu0 %v4060_v28 }
 0x238   : > { %v4220_v29 = vpop.permute.xlu1 %4219  ;;  %5063 = vmatmul.mubr.msk.f32.vlgmr.msra.gmra.mrb[2].mxu1 %vm568_vm8, %v3882_v37  ;;  %v4057_v36 = vpop.permute.xlu0 %4056 }
 0x239   : > { %v4061_v40 = vsel %vm4058_vm14, %v4055_v27, %v4057_v36  ;;  %4140 = vmatprep.subr.mxu1 %v4057_v36  ;;  %4204 = vmatprep.mubr.f32.mxu1 %v5365_v5 }
 0x23a   : > { %4141 = vmatpush1.msra.mxu1 %v4061_v40 }
 0x23b   : > { %5062 = vmatmul.mubr.msk.f32.vlgmr.msra.gmra.mrb[2].mxu0 %vm568_vm8, %v3882_v37 }
 0x23c   : > { %4070 = vmatpush1.msra.mxu0 %v4059_v30  ;;  %v4218_v31 = vpop.permute.xlu1 %4217  ;;  %v4222_v32 = vpop.permute.xlu0 %4221  ;;  %4133 = vmatprep.mubr.f32.mxu0 %v5365_v5 }
 0x23d   : > { %v4227_v33 = vsel %vm4225_vm15, %v4220_v29, %v4222_v32  ;;  %v4226_v43 = vsel %vm4225_vm15, %v4218_v31, %v4220_v29 }
 0x23e   : > { %4236 = vmatprep.subr.mxu0 %v4227_v33 }
 0x240   : > { %v4387_v35 = vpop.permute.xlu1 %4386  ;;  %5065 = vmatmul.mubr.msk.f32.vlgmr.msra.gmra.mrb[2].mxu1 %vm568_vm8, %v4049_v34  ;;  %v4224_v38 = vpop.permute.xlu0 %4223 }
 0x241   : > { %v4228_v39 = vsel %vm4225_vm15, %v4222_v32, %v4224_v38  ;;  %4307 = vmatprep.subr.mxu1 %v4224_v38  ;;  %4371 = vmatprep.mubr.f32.mxu1 %v5365_v5 }
 0x242   : > { %4308 = vmatpush1.msra.mxu1 %v4228_v39  ;;  %v5264_v39 = vld [vmem:[%s5529_s17] sm:$0xff] }
 0x243   : > { %5064 = vmatmul.mubr.msk.f32.vlgmr.msra.gmra.mrb[2].mxu0 %vm568_vm8, %v4049_v34  ;;  %v5263_v34 = vld [vmem:[%s5529_s17 + $0x8] sm:$0xff]  ;;  %s5297_s17 = sshll.u32 %s5391_s9, 4  ;;  %s5298_s17 = int_to_ptr.vmem [resolvable:$false] %s5297_s17 }
 0x244   : > { %4237 = vmatpush1.msra.mxu0 %v4226_v43  ;;  %v4385_v44 = vpop.permute.xlu1 %4384  ;;  %v4389_v45 = vpop.permute.xlu0 %4388  ;;  %4300 = vmatprep.mubr.f32.mxu0 %v5365_v5  ;;  %s5299_s21 = scalar_lea.vmem %s5298_s17, 512  ;;  %p5300_p3 = scmp.lt.s32.totalorder %s5843_s25, %s5298_s17 }
 0x245   : > { %v4394_v46 = vsel %vm4392_vm1, %v4387_v35, %v4389_v45  ;;  %v4393_v51 = vsel %vm4392_vm1, %v4385_v44, %v4387_v35  ;;  %p5301_p4 = scmp.lt.s32.totalorder %s5299_s21, %s5293_s18 }
 0x246   : > { %4403 = vmatprep.subr.mxu0 %v4394_v46 }
 0x247   : > { %p5302_p7 = por %p5301_p4, %p5300_p3 }
 0x248   : > { %5067 = vmatmul.mubr.msk.f32.vlgmr.msra.gmra.mrb[2].mxu1 %vm568_vm8, %v4216_v47  ;;  %v4391_v48 = vpop.permute.xlu0 %4390  ;;  %v4554_v50 = vpop.permute.xlu1 %4553 }
 0x249   : > { %v4395_v49 = vsel %vm4392_vm1, %v4389_v45, %v4391_v48  ;;  %4474 = vmatprep.subr.mxu1 %v4391_v48  ;;  %4538 = vmatprep.mubr.f32.mxu1 %v5365_v5  ;;  %p5303_p8 = pnand %p5302_p7, %p5296_p13 }
 0x24a   : > { %4475 = vmatpush1.msra.mxu1 %v4395_v49 }
 0x24b   : > { %5066 = vmatmul.mubr.msk.f32.vlgmr.msra.gmra.mrb[2].mxu0 %vm568_vm8, %v4216_v47 }
 0x24c   : > { %4404 = vmatpush1.msra.mxu0 %v4393_v51  ;;  %v4556_v52 = vpop.permute.xlu0 %4555  ;;  %4467 = vmatprep.mubr.f32.mxu0 %v5365_v5  ;;  %v4552_v55 = vpop.permute.xlu1 %4551 }
 0x24d   : > { %v4561_v53 = vsel %vm4559_vm2, %v4554_v50, %v4556_v52  ;;  %v4560_v58 = vsel %vm4559_vm2, %v4552_v55, %v4554_v50 }
 0x24e   : > { %4570 = vmatprep.subr.mxu0 %v4561_v53 }
 0x250   : > { %5069 = vmatmul.mubr.msk.f32.vlgmr.msra.gmra.mrb[2].mxu1 %vm568_vm8, %v4383_v54  ;;  %v4558_v56 = vpop.permute.xlu0 %4557 }
 0x251   : > { %v4562_v57 = vsel %vm4559_vm2, %v4556_v52, %v4558_v56  ;;  %4641 = vmatprep.subr.mxu1 %v4558_v56  ;;  %4705 = vmatprep.mubr.f32.mxu1 %v5365_v5 }
 0x252   : > { %4642 = vmatpush1.msra.mxu1 %v4562_v57 }
 0x253   : > { %5068 = vmatmul.mubr.msk.f32.vlgmr.msra.gmra.mrb[2].mxu0 %vm568_vm8, %v4383_v54 }
 0x254   : > { %4571 = vmatpush1.msra.mxu0 %v4560_v58  ;;  %4634 = vmatprep.mubr.f32.mxu0 %v5365_v5 }
 0x258   : > { %5071 = vmatmul.mubr.msk.f32.vlgmr.msra.gmra.mrb[2].mxu1 %vm568_vm8, %v4550_v59 }
 0x259   : > { %4887 = vmatprep.mubr.f32.mxu1 %v5365_v5 }
 0x25b   : > { %5070 = vmatmul.mubr.msk.f32.vlgmr.msra.gmra.mrb[2].mxu0 %vm568_vm8, %v4550_v59 }
 0x25c   : > { %4816 = vmatprep.mubr.f32.mxu0 %v5365_v5 }
 0x25f   : > { %v4720_v60 = vpop.permute.xlu1 %4719 }
 0x32b   : > { %v4707_v61 = vpop.f32.mrb[2].mxu1 }
 0x32c   : > { %v4724_v62 = vadd.f32 %v4720_v60, %v4707_v61  ;;  %v4709_v63 = vpop.f32.mrb[3].mxu1 }
 0x32d   : > { %v4725_v0 = vadd.f32 %v4720_v60, %v4709_v63 }
 0x32e   : > { %vm4728_vm3 = vcmp.gt.f32.partialorder %v4724_v62, 0.0  ;;  %v4732_v1 = vmul.f32 0.01, %v4724_v62  ;;  %v4636_v2 = vpop.f32.mrb[2].mxu0 }
 0x32f   : > { %vm4729_vm4 = vcmp.gt.f32.partialorder %v4725_v0, 0.0  ;;  %v4733_v3 = vmul.f32 0.01, %v4725_v0  ;;  %v4722_v4 = vadd.f32 %v4720_v60, %v4636_v2  ;;  %v4638_v6 = vpop.f32.mrb[3].mxu0 }
 0x330   : > { %v4736_v7 = vsel %vm4728_vm3, %v4724_v62, %v4732_v1  ;;  %v4723_v8 = vadd.f32 %v4720_v60, %v4638_v6 }
 0x331   : > { %vm4726_vm5 = vcmp.gt.f32.partialorder %v4722_v4, 0.0  ;;  %v4730_v9 = vmul.f32 0.01, %v4722_v4  ;;  %v4737_v10 = vsel %vm4729_vm4, %v4725_v0, %v4733_v3  ;;  %v4740_v13 = vadd.f32 %v5260_v12, %v4736_v7 }
 0x332   : > { %vm4727_vm6 = vcmp.gt.f32.partialorder %v4723_v8, 0.0  ;;  %v4731_v11 = vmul.f32 0.01, %v4723_v8  ;;  %v4741_v5 = vadd.f32 %v4737_v10, %v5564_v41  ;;  %v4747_v41 = vpop.permute.xlu0 %4746 }
 0x333   : > { %v4734_v14 = vsel %vm4726_vm5, %v4722_v4, %v4730_v9 }
 0x334   : > { %4823 = vmatprep.subr.mxu1 %v4741_v5  ;;  %v4735_v16 = vsel %vm4727_vm6, %v4723_v8, %v4731_v11  ;;  %v4738_v20 = vadd.f32 %v5262_v19, %v4734_v14 }
 0x335   : > { %4824 = vmatpush1.msra.mxu1 %v4740_v13  ;;  %v4739_v18 = vadd.f32 %v5261_v17, %v4735_v16 }
 0x336   : > { %5073 = vmatmul.mubr.msk.f32.vlgmr.msra.gmra.mrb[4].mxu1 %vm568_vm8, %v4742_v15 }
 0x337   : > { %4752 = vmatprep.subr.mxu0 %v4739_v18 }
 0x338   : > { %4753 = vmatpush1.msra.mxu0 %v4738_v20 }
 0x339   : > { %5072 = vmatmul.mubr.msk.f32.vlgmr.msra.gmra.mrb[4].mxu0 %vm568_vm8, %v4742_v15 }
 0x409   : > { %v4889_v21 = vpop.f32.mrb[4].mxu1 }
 0x40a   : > { %v4890_v22 = vadd.f32 %v4889_v21, %v4747_v41  ;;  %v4891_v23 = vpop.f32.mrb[5].mxu1 }
 0x40b   : > { %v4892_v24 = vadd.f32 %v4891_v23, %v4747_v41 }
 0x40c   : > { %vm4896_vm7 = vcmp.gt.f32.partialorder %v4890_v22, 0.0  ;;  %v4900_v25 = vmul.f32 0.01, %v4890_v22  ;;  %v4818_v26 = vpop.f32.mrb[4].mxu0 }
 0x40d   : > { %vm4897_vm9 = vcmp.gt.f32.partialorder %v4892_v24, 0.0  ;;  %v4901_v42 = vmul.f32 0.01, %v4892_v24  ;;  %v4819_v27 = vadd.f32 %v4818_v26, %v4747_v41  ;;  %v4820_v28 = vpop.f32.mrb[5].mxu0 }
 0x40e   : > { %v4904_v37 = vsel %vm4896_vm7, %v4890_v22, %v4900_v25  ;;  %v4821_v29 = vadd.f32 %v4820_v28, %v4747_v41 }
 0x40f   : > { %v4905_v36 = vsel %vm4897_vm9, %v4892_v24, %v4901_v42  ;;  %vm4894_vm8 = vcmp.gt.f32.partialorder %v4819_v27, 0.0  ;;  %v4898_v40 = vmul.f32 0.01, %v4819_v27 }
 0x410   : > { %v4911_v30 = vcombine.low %v4904_v37, %v4905_v36  ;;  %vm4895_vm11 = vcmp.gt.f32.partialorder %v4821_v29, 0.0  ;;  %v4899_v31 = vmul.f32 0.01, %v4821_v29 }
 0x411   : > { %v4902_v32 = vsel %vm4894_vm8, %v4819_v27, %v4898_v40 }
 0x412   : > { %v4903_v33 = vsel %vm4895_vm11, %v4821_v29, %v4899_v31  ;;  %v4915_v35 = vadd.f32 %v5263_v34, %v4911_v30 }
 0x413   : > { %v4910_v38 = vcombine.low %v4902_v32, %v4903_v33 }
 0x414   : > { %4919 = vst.msk [vmem:[%s5531_s10 + $0x8] sm:$0xff] %vm4918_vm12, %v4915_v35 }
 0x415   : > { %v4914_v43 = vadd.f32 %v5264_v39, %v4910_v38 }
 0x417   : > { %4916 = vst [vmem:[%s5531_s10] sm:$0xff] %v4914_v43 }
 0x418   : > { %5306 = shalt.err (!%p5303_p8)
}
 0x419   : > { %s5307_s23 = scalar_lea.hbm %s5841_s12, 256  ;;  %s5311_s20 = scalar_lea.hbm %s5894_s8, 512 }
 0x41a   : > { %p5308_p12 = scmp.ne.s32.totalorder %s5841_s12, %s5307_s23  ;;  %p5312_p1 = scmp.lt.u32.totalorder %s5841_s12, %s5894_s8 }
 0x41b   : > { %p5313_p5 = scmp.lt.u32.totalorder %s5311_s20, %s5307_s23  ;;  %p5315_p9 = scmp.lt.u32.totalorder %s5307_s23, %s5841_s12 }
 0x41c   : > { %p5309_p0 = pnand %p5308_p12, %p5906_p10 }
 0x41d   : > { %p5314_p6 = por %p5313_p5, %p5312_p1 }
 0x41e   : > { %p5310_p2 = pneg %p5309_p0 }
 0x41f   : > { %p5316_p11 = por %p5315_p9, %p5314_p6 }
 0x421   : > { %p5317_p13 = pnand %p5316_p11, %p5310_p2 }
 0x423   : > { %5320 = shalt.err (!%p5317_p13)
}
 0x424   : > { %5181 = dma.vmem_to_hbm [thread:$0]  (%p5906_p10), %s5843_s25, 256, %s5841_s12, %s4921_s13  }
 0x425 PF: > { %p5193_p3 = scmp.ge.s32.totalorder %s5359_s30, 2  ;;  %s4947_s26 = sand.u32 1, %s5347_s27  }
 0x426   : > { %p5907_p4 = scmp.ne.s32.totalorder %s5899_s16, 0  ;;  %s4948_s18 = scalar_lea.sflag [#allocation5], %s4947_s26 }
 0x428   : > { %p5188_p7 = pnand %p5193_p3, %p5907_p4 }
 0x42a   : > { %5342 = dma.done.wait (!%p5188_p7), %s4948_s18, 256  }
 0x42b   : > { %5344 = vsyncadd (!%p5188_p7), %s4948_s18, 4294967040  ;;  %p19_p8 = scmp.ge.s32.totalorder %s5462_s11, 4   ;;  %s5908_s27 = smov %s5351_s28 }
 0x42c   : > { %s5909_s28 = smov %s5355_s29  ;;  %s5910_s29 = smov %s5473_s14 }
 0x42d   : > { %s5911_s30 = smov %s5462_s11  ;;  %21 = sbr.rel (!%p19_p8) target bundleno = 4 (0x4), region = 120 }
 0x434   :  { %4953 = vsyncpa [#allocation4], 1 }
 0x435   :  { %4955 = vsyncpa [#allocation4 + $0x1], 1 }
 0x436   :  { %4956 = vsyncpa [#allocation5], 1 }
 0x437   :  { %4958 = vsyncpa [#allocation5 + $0x1], 1 }

</bundles_post_ra>
